<compile_context>
chip_gen: v5e
topology: v5e:2x2
jax: 0.10.0
libtpu: 0.0.40
codegen_flags: <defaults>
</compile_context>

<pallas_src>
import functools
import math

import jax
import jax.numpy as jnp
import numpy as np
from jax.experimental import pallas as pl
from jax.experimental.pallas import tpu as pltpu

FEATURE_DIM = 1024     # densenet121 classifier.in_features
HIDDEN_DIM = 500       # nn.Linear(1024, 500)
HIDDEN_PAD = 512       # 500 padded to a lane-friendly multiple of 128
NC_PAD = 128           # final output padded lane-dense (>= any realistic num_classes)
DROP_P = 0.9           # nn.Dropout(p=0.9)
KEEP_PROB = 1.0 - DROP_P


def _round_up(n, m):
    return ((n + m - 1) // m) * m


def _head_kernel(*refs, training):
    """Fused classifier head for one batch tile.

    training=True : (feat, mask, w1, b1, w2, b2, out)
    training=False: (feat,       w1, b1, w2, b2, out)

    feat : [TB, 1024] bf16       backbone features
    mask : [TB, 512]  f32        inverted-dropout mask (0 or 1/keep_prob)
    w1   : [1024, 512] bf16      Linear #1 weight (500 padded to 512)
    b1   : [1, 512]   f32
    w2   : [512, 128] bf16       Linear #2 weight, native [K, N], zero padded
    b2   : [1, 128]   f32
    out  : [TB, 128]  f32        sigmoid probabilities (cols >= NC are junk, sliced off)
    """
    if training:
        feat_ref, mask_ref, w1_ref, b1_ref, w2_ref, b2_ref, out_ref = refs
    else:
        feat_ref, w1_ref, b1_ref, w2_ref, b2_ref, out_ref = refs
        mask_ref = None

    # Linear(1024, 500) — MXU matmul, f32 accumulation.
    h = jnp.dot(feat_ref[...], w1_ref[...],
                preferred_element_type=jnp.float32) + b1_ref[...]      # [TB, 512]

    # Dropout(p=0.9): identity in eval mode, precomputed inverted mask in training.
    if training:
        h = h * mask_ref[...]

    # Linear(500, num_classes) — weight natively [K, N], lane-dense output.
    logits = jnp.dot(h.astype(jnp.bfloat16), w2_ref[...],
                     preferred_element_type=jnp.float32) + b2_ref[...]  # [TB, 128]

    out_ref[...] = jax.nn.sigmoid(logits)


@functools.partial(jax.jit, static_argnames=("num_classes", "training"))
def densenet121_with_dropout_forward(x, params, dropout_key=None, *,
                                     num_classes, training=False):
    """x: [B, C, H, W] float32 (NCHW, like PyTorch). Returns [B, num_classes]."""
    B = x.shape[0]

    # --- stand-in backbone (wrapper / XLA): pool -> Linear(C,1024) -> ReLU ---
    pooled = jnp.mean(x.astype(jnp.float32), axis=(-2, -1))             # [B, C]
    feat = jax.nn.relu(pooled @ params["wf"] + params["bf"])            # [B, 1024]
    feat = feat.astype(jnp.bfloat16)

    # --- batch tiling: TB rows per grid step ---------------------------------
    TB = 128 if B >= 128 else _round_up(B, 8)
    B_pad = _round_up(B, TB)
    if B_pad != B:
        feat = jnp.pad(feat, ((0, B_pad - B), (0, 0)))

    inputs = [feat]
    in_specs = [pl.BlockSpec((TB, FEATURE_DIM), lambda i: (i, 0))]

    if training:
        keep = jax.random.bernoulli(dropout_key, KEEP_PROB, (B_pad, HIDDEN_PAD))
        mask = keep.astype(jnp.float32) * (1.0 / KEEP_PROB)
        inputs.append(mask)
        in_specs.append(pl.BlockSpec((TB, HIDDEN_PAD), lambda i: (i, 0)))

    # Weights: constant index_map -> resident in VMEM across all grid steps.
    inputs += [params["w1"], params["b1"], params["w2"], params["b2"]]
    in_specs += [
        pl.BlockSpec((FEATURE_DIM, HIDDEN_PAD), lambda i: (0, 0)),
        pl.BlockSpec((1, HIDDEN_PAD), lambda i: (0, 0)),
        pl.BlockSpec((HIDDEN_PAD, NC_PAD), lambda i: (0, 0)),
        pl.BlockSpec((1, NC_PAD), lambda i: (0, 0)),
    ]

    flops = 2 * B_pad * (FEATURE_DIM * HIDDEN_PAD + HIDDEN_PAD * NC_PAD)
    bytes_accessed = (
        B_pad * FEATURE_DIM * 2                      # feat (bf16)
        + (B_pad * HIDDEN_PAD * 4 if training else 0)  # dropout mask
        + FEATURE_DIM * HIDDEN_PAD * 2 + HIDDEN_PAD * 4      # w1 + b1
        + HIDDEN_PAD * NC_PAD * 2 + NC_PAD * 4               # w2 + b2
        + B_pad * NC_PAD * 4                                 # out
    )

    out = pl.pallas_call(
        functools.partial(_head_kernel, training=training),
        out_shape=jax.ShapeDtypeStruct((B_pad, NC_PAD), jnp.float32),
        grid=(B_pad // TB,),
        in_specs=in_specs,
        out_specs=pl.BlockSpec((TB, NC_PAD), lambda i: (i, 0)),
        compiler_params=pltpu.CompilerParams(
            dimension_semantics=("parallel",)),
        cost_estimate=pl.CostEstimate(
            flops=flops,
            transcendentals=B_pad * NC_PAD,
            bytes_accessed=bytes_accessed),
    )(*inputs)

    return out[:B, :num_classes]


def init_params(key, in_channels, num_classes):
    """Deterministic synthetic parameters (PyTorch-default-style uniform init).

    Classifier weights are stored bf16, padded to lane-friendly shapes:
      w1 [1024, 512], w2 [512, 128] ([K, N] orientation), biases f32 padded.
    """
    keys = jax.random.split(key, 6)

    def u(k, shape, fan_in):
        bound = 1.0 / math.sqrt(fan_in)
        return jax.random.uniform(k, shape, jnp.float32, -bound, bound)

    w1 = u(keys[2], (FEATURE_DIM, HIDDEN_DIM), FEATURE_DIM)
    b1 = u(keys[3], (1, HIDDEN_DIM), FEATURE_DIM)
    w2 = u(keys[4], (HIDDEN_DIM, num_classes), HIDDEN_DIM)
    b2 = u(keys[5], (1, num_classes), HIDDEN_DIM)

    return {
        # stand-in backbone projection (runs in the wrapper, stays f32)
        "wf": u(keys[0], (in_channels, FEATURE_DIM), in_channels),
        "bf": u(keys[1], (1, FEATURE_DIM), in_channels),
        # classifier Linear #1 (500 -> 512 lane pad)
        "w1": jnp.pad(w1, ((0, 0), (0, HIDDEN_PAD - HIDDEN_DIM))).astype(jnp.bfloat16),
        "b1": jnp.pad(b1, ((0, 0), (0, HIDDEN_PAD - HIDDEN_DIM))),
        # classifier Linear #2, native [K, N], zero padded to [512, 128]
        "w2": jnp.pad(w2, ((0, HIDDEN_PAD - HIDDEN_DIM),
                           (0, NC_PAD - num_classes))).astype(jnp.bfloat16),
        "b2": jnp.pad(b2, ((0, 0), (0, NC_PAD - num_classes))),
    }


def reference_forward(x, params, dropout_key=None, *, num_classes, training=False):
    """Pure-JAX reference of the same computation (same bf16 casts / padding)."""
    B = x.shape[0]
    pooled = jnp.mean(x.astype(jnp.float32), axis=(-2, -1))
    feat = jax.nn.relu(pooled @ params["wf"] + params["bf"]).astype(jnp.bfloat16)
    h = jnp.dot(feat, params["w1"],
                preferred_element_type=jnp.float32) + params["b1"]
    if training:
        TB = 128 if B >= 128 else _round_up(B, 8)
        B_pad = _round_up(B, TB)
        keep = jax.random.bernoulli(dropout_key, KEEP_PROB, (B_pad, HIDDEN_PAD))
        mask = keep.astype(jnp.float32) * (1.0 / KEEP_PROB)
        h = h * mask[:B]
    logits = jnp.dot(h.astype(jnp.bfloat16), params["w2"],
                     preferred_element_type=jnp.float32) + params["b2"]
    return jax.nn.sigmoid(logits)[:, :num_classes]


if __name__ == "__main__":
    num_classes = 14          # CheXpert label count
    B, C, H, W = 2, 3, 16, 16

    key = jax.random.PRNGKey(0)
    k_x, k_p, k_d = jax.random.split(key, 3)
    x = jax.random.normal(k_x, (B, C, H, W), jnp.float32)
    params = init_params(k_p, C, num_classes)

    # Eval mode (Dropout == identity): must match the pure-JAX reference.
    out = densenet121_with_dropout_forward(x, params,
                                           num_classes=num_classes,
                                           training=False)
    out = jax.block_until_ready(out)
    ref = jax.block_until_ready(
        reference_forward(x, params, num_classes=num_classes, training=False))
    assert out.shape == (B, num_classes)
    np.testing.assert_allclose(np.asarray(out), np.asarray(ref),
                               rtol=2e-2, atol=2e-2)

    # Training mode: same jax.random key -> identical dropout mask -> must match.
    out_t = densenet121_with_dropout_forward(x, params, k_d,
                                             num_classes=num_classes,
                                             training=True)
    out_t = jax.block_until_ready(out_t)
    ref_t = jax.block_until_ready(
        reference_forward(x, params, k_d, num_classes=num_classes, training=True))
    assert out_t.shape == (B, num_classes)
    np.testing.assert_allclose(np.asarray(out_t), np.asarray(ref_t),
                               rtol=2e-2, atol=2e-2)
    o = np.asarray(out_t)
    assert np.all(np.isfinite(o)) and np.all(o >= 0.0) and np.all(o <= 1.0)

    print("KERNEL_OK")
</pallas_src>

<mosaic_0001>
module attributes {stable_mosaic.version = 11 : i64} {
  func.func @_head_kernel(%arg0: i32, %arg1: memref<8x1024xbf16, #tpu.memory_space<vmem>>, %arg2: memref<1024x512xbf16, #tpu.memory_space<vmem>>, %arg3: memref<1x512xf32, #tpu.memory_space<vmem>>, %arg4: memref<512x128xbf16, #tpu.memory_space<vmem>>, %arg5: memref<1x128xf32, #tpu.memory_space<vmem>>, %arg6: memref<8x128xf32, #tpu.memory_space<vmem>>) attributes {dimension_semantics = [#tpu.dimension_semantics<parallel>], iteration_bounds = array<i64: 1>, scalar_prefetch = 0 : i64, scratch_operands = 0 : i64, tpu.core_type = #tpu.core_type<tc>, window_params = [{transform_indices = @transform_0, window_bounds = array<i64: 8, 1024>}, {pipeline_mode = #tpu.pipeline_mode<synchronous>, transform_indices = @transform_1, window_bounds = array<i64: 1024, 512>}, {pipeline_mode = #tpu.pipeline_mode<synchronous>, transform_indices = @transform_2, window_bounds = array<i64: 1, 512>}, {pipeline_mode = #tpu.pipeline_mode<synchronous>, transform_indices = @transform_3, window_bounds = array<i64: 512, 128>}, {pipeline_mode = #tpu.pipeline_mode<synchronous>, transform_indices = @transform_4, window_bounds = array<i64: 1, 128>}, {transform_indices = @transform_5, window_bounds = array<i64: 8, 128>}]} {
    %c0 = arith.constant 0 : index
    %c0_0 = arith.constant 0 : index
    %0 = vector.load %arg1[%c0, %c0_0] : memref<8x1024xbf16, #tpu.memory_space<vmem>>, vector<8x1024xbf16>
    %c0_1 = arith.constant 0 : index
    %c0_2 = arith.constant 0 : index
    %1 = vector.load %arg2[%c0_1, %c0_2] : memref<1024x512xbf16, #tpu.memory_space<vmem>>, vector<1024x512xbf16>
    %cst = arith.constant dense<0.000000e+00> : vector<8x512xf32>
    %2 = tpu.matmul %0, %1, %cst {dimension_numbers = #tpu.dot_dimension_numbers<[1], [0], [0], [1], [0, 0, 1, 1], [], []>} : vector<8x1024xbf16>, vector<1024x512xbf16>, vector<8x512xf32> -> vector<8x512xf32>
    %c0_3 = arith.constant 0 : index
    %c0_4 = arith.constant 0 : index
    %3 = vector.load %arg3[%c0_3, %c0_4] : memref<1x512xf32, #tpu.memory_space<vmem>>, vector<1x512xf32>
    %4 = vector.broadcast %3 : vector<1x512xf32> to vector<8x512xf32>
    %5 = arith.addf %2, %4 : vector<8x512xf32>
    %6 = arith.truncf %5 : vector<8x512xf32> to vector<8x512xbf16>
    %c0_5 = arith.constant 0 : index
    %c0_6 = arith.constant 0 : index
    %7 = vector.load %arg4[%c0_5, %c0_6] : memref<512x128xbf16, #tpu.memory_space<vmem>>, vector<512x128xbf16>
    %cst_7 = arith.constant dense<0.000000e+00> : vector<8x128xf32>
    %8 = tpu.matmul %6, %7, %cst_7 {dimension_numbers = #tpu.dot_dimension_numbers<[1], [0], [0], [1], [0, 0, 1, 1], [], []>} : vector<8x512xbf16>, vector<512x128xbf16>, vector<8x128xf32> -> vector<8x128xf32>
    %c0_8 = arith.constant 0 : index
    %c0_9 = arith.constant 0 : index
    %9 = vector.load %arg5[%c0_8, %c0_9] : memref<1x128xf32, #tpu.memory_space<vmem>>, vector<1x128xf32>
    %10 = vector.broadcast %9 : vector<1x128xf32> to vector<8x128xf32>
    %11 = arith.addf %8, %10 : vector<8x128xf32>
    %12 = arith.negf %11 : vector<8x128xf32>
    %13 = math.exp %12 : vector<8x128xf32>
    %cst_10 = arith.constant 1.000000e+00 : f32
    %14 = vector.broadcast %cst_10 : f32 to vector<8x128xf32>
    %15 = arith.addf %14, %13 : vector<8x128xf32>
    %16 = arith.divf %14, %15 : vector<8x128xf32>
    %c0_11 = arith.constant 0 : index
    %c0_12 = arith.constant 0 : index
    %17 = vector.load %arg6[%c0_11, %c0_12] : memref<8x128xf32, #tpu.memory_space<vmem>>, vector<8x128xf32>
    tpu.vector_store %arg6[%c0_11, %c0_12], %16 {strides = array<i32>} : memref<8x128xf32, #tpu.memory_space<vmem>>, vector<8x128xf32>,
    return
  }
  func.func @transform_0(%arg0: i32) -> (i32, i32) {
    %c0_i32 = arith.constant 0 : i32
    %c0_i32_0 = arith.constant 0 : i32
    return %arg0, %c0_i32 : i32, i32
  }
  func.func @transform_1(%arg0: i32) -> (i32, i32) {
    %c0_i32 = arith.constant 0 : i32
    %c0_i32_0 = arith.constant 0 : i32
    %c0_i32_1 = arith.constant 0 : i32
    return %c0_i32, %c0_i32_0 : i32, i32
  }
  func.func @transform_2(%arg0: i32) -> (i32, i32) {
    %c0_i32 = arith.constant 0 : i32
    %c0_i32_0 = arith.constant 0 : i32
    %c0_i32_1 = arith.constant 0 : i32
    return %c0_i32, %c0_i32_0 : i32, i32
  }
  func.func @transform_3(%arg0: i32) -> (i32, i32) {
    %c0_i32 = arith.constant 0 : i32
    %c0_i32_0 = arith.constant 0 : i32
    %c0_i32_1 = arith.constant 0 : i32
    return %c0_i32, %c0_i32_0 : i32, i32
  }
  func.func @transform_4(%arg0: i32) -> (i32, i32) {
    %c0_i32 = arith.constant 0 : i32
    %c0_i32_0 = arith.constant 0 : i32
    %c0_i32_1 = arith.constant 0 : i32
    return %c0_i32, %c0_i32_0 : i32, i32
  }
  func.func @transform_5(%arg0: i32) -> (i32, i32) {
    %c0_i32 = arith.constant 0 : i32
    %c0_i32_0 = arith.constant 0 : i32
    return %arg0, %c0_i32 : i32, i32
  }
}

</mosaic_0001>

<bundles_post_ra>
// kernel: densenet121_with_dropout_forward.1
= control target key start
LH: loop header
LB: loop body
LE: loop exit
PB: predicated region body
PF: predicated region fallthrough
CT: control target
= control target key end

     0   :  { %10 = vsyncpa [#allocation3], 0  ;;  %s4028_s0 = inlined_call_operand.vmem [shape: bf16[8,1024], index: 0, kind: input, shape index: {}]   ;;  %s4029_s1 = inlined_call_operand.hbm [shape: bf16[1024,512], index: 1, kind: input, shape index: {}]   ;;  %s4030_s2 = inlined_call_operand.vmem [shape: f32[1,512], index: 2, kind: input, shape index: {}]   ;;  %s4031_s3 = inlined_call_operand.hbm [shape: bf16[512,128], index: 3, kind: input, shape index: {}]   ;;  %s4032_s4 = inlined_call_operand.vmem [shape: f32[1,128], index: 4, kind: input, shape index: {}]   ;;  %s4033_s5 = inlined_call_operand.vmem [shape: f32[8,128], index: 5, kind: output, shape index: {}]  }
   0x1   :  { %s18_s20 = sshll.u32 %s4029_s1, 4  ;;  %s19_s20 = int_to_ptr.hbm [resolvable:$true] %s18_s20 }
   0x2   :  { %11 = vsyncpa [#allocation5], 0  ;;  %s3892_s21 = smov [#allocation2]   ;;  %s33_s25 = sshll.u32 %s4031_s3, 4  ;;  %s34_s25 = int_to_ptr.hbm [resolvable:$true] %s33_s25 }
   0x3   :  { %s20_s22 = sshll.u32 %s3892_s21, 4  ;;  %s3893_s26 = smov 256   ;;  %s21_s22 = int_to_ptr.vmem [resolvable:$true] %s20_s22 }
   0x4   :  { %s3894_s27 = smov 16   ;;  %s3895_s28 = smov [#allocation4]  }
   0x5   :  { %26 = dma.hbm_to_vmem [thread:$0]  %s19_s20, 32768, %s21_s22, [#allocation3], %s3893_s26, %s3893_s26, %s3894_s27  }
   0x6   :  { %s35_s29 = sshll.u32 %s3895_s28, 4  ;;  %s3896_s30 = smov 64   ;;  %s36_s29 = int_to_ptr.vmem [resolvable:$true] %s35_s29 }
   0x7   :  { %s3897_s6 = smov 4  }
   0x8   :  { %41 = dma.hbm_to_vmem [thread:$0]  %s34_s25, 4096, %s36_s29, [#allocation5], %s3896_s30, %s3896_s30, %s3897_s6  }
   0x9   :  { %3888 = dma.done.wait [#allocation3], 32768  }
   0xa   :  { %3889 = vsyncadd [#allocation3], 4294934528 }
   0xb   :  { %3890 = dma.done.wait [#allocation5], 4096  }
   0xc   :  { %3891 = vsyncadd [#allocation5], 4294963200  ;;  %v2502_v0 = vld [vmem:[#allocation2 + $0xe0] sm:$0xf]  ;;  %v3571_v1 = vld [vmem:[#allocation2 + $0xec] sm:$0xf0] }
   0xd   :  { %v2630_v2 = vld [vmem:[#allocation2 + $0x1e0] sm:$0xf]  ;;  %v2503_v3 = vor.u32 %v3571_v1, %v2502_v0  ;;  %v3603_v4 = vld [vmem:[#allocation2 + $0x1ec] sm:$0xf0] }
   0xe   :  { %v2758_v5 = vld [vmem:[#allocation2 + $0x2e0] sm:$0xf]  ;;  %v3635_v6 = vld [vmem:[#allocation2 + $0x2ec] sm:$0xf0]  ;;  %v2631_v7 = vor.u32 %v3603_v4, %v2630_v2 }
   0xf   :  { %v2759_v8 = vor.u32 %v3635_v6, %v2758_v5  ;;  %v2886_v9 = vld [vmem:[#allocation2 + $0x3e0] sm:$0xf]  ;;  %v3667_v10 = vld [vmem:[#allocation2 + $0x3ec] sm:$0xf0]  ;;  %1630 = vmatpush.bf16.msra.mxu0 %v2503_v3 }
  0x10   :  { %v2486_v11 = vld [vmem:[#allocation2 + $0xc0] sm:$0xf]  ;;  %v2887_v12 = vor.u32 %v3667_v10, %v2886_v9  ;;  %v3567_v13 = vld [vmem:[#allocation2 + $0xcc] sm:$0xf0]  ;;  %1643 = vmatpush.bf16.msra.mxu1 %v2631_v7 }
  0x11   :  { %v2614_v14 = vld [vmem:[#allocation2 + $0x1c0] sm:$0xf]  ;;  %v3599_v15 = vld [vmem:[#allocation2 + $0x1cc] sm:$0xf0]  ;;  %1656 = vmatpush.bf16.msra.mxu2 %v2759_v8  ;;  %v2487_v16 = vor.u32 %v3567_v13, %v2486_v11 }
  0x12   :  { %v2615_v17 = vor.u32 %v3599_v15, %v2614_v14  ;;  %v2742_v18 = vld [vmem:[#allocation2 + $0x2c0] sm:$0xf]  ;;  %v3631_v19 = vld [vmem:[#allocation2 + $0x2cc] sm:$0xf0]  ;;  %1669 = vmatpush.bf16.msra.mxu3 %v2887_v12 }
  0x13   :  { %v2870_v20 = vld [vmem:[#allocation2 + $0x3c0] sm:$0xf]  ;;  %v2743_v21 = vor.u32 %v3631_v19, %v2742_v18  ;;  %v3663_v22 = vld [vmem:[#allocation2 + $0x3cc] sm:$0xf0]  ;;  %1631 = vmatpush.bf16.msra.mxu0 %v2487_v16 }
  0x14   :  { %v2470_v23 = vld [vmem:[#allocation2 + $0xa0] sm:$0xf]  ;;  %v3563_v24 = vld [vmem:[#allocation2 + $0xac] sm:$0xf0]  ;;  %v2871_v25 = vor.u32 %v3663_v22, %v2870_v20  ;;  %1644 = vmatpush.bf16.msra.mxu1 %v2615_v17 }
  0x15   :  { %v2598_v26 = vld [vmem:[#allocation2 + $0x1a0] sm:$0xf]  ;;  %v3595_v27 = vld [vmem:[#allocation2 + $0x1ac] sm:$0xf0]  ;;  %v2471_v29 = vor.u32 %v3563_v24, %v2470_v23  ;;  %1657 = vmatpush.bf16.msra.mxu2 %v2743_v21 }
  0x16   :  { %v2726_v28 = vld [vmem:[#allocation2 + $0x2a0] sm:$0xf]  ;;  %v3627_v30 = vld [vmem:[#allocation2 + $0x2ac] sm:$0xf0]  ;;  %v2599_v33 = vor.u32 %v3595_v27, %v2598_v26  ;;  %1670 = vmatpush.bf16.msra.mxu3 %v2871_v25 }
  0x17   :  { %v2854_v31 = vld [vmem:[#allocation2 + $0x3a0] sm:$0xf]  ;;  %v3659_v32 = vld [vmem:[#allocation2 + $0x3ac] sm:$0xf0]  ;;  %v2727_v34 = vor.u32 %v3627_v30, %v2726_v28  ;;  %1632 = vmatpush.bf16.msra.mxu0 %v2471_v29 }
  0x18   :  { %v2454_v35 = vld [vmem:[#allocation2 + $0x80] sm:$0xf]  ;;  %v3559_v36 = vld [vmem:[#allocation2 + $0x8c] sm:$0xf0]  ;;  %v2855_v38 = vor.u32 %v3659_v32, %v2854_v31  ;;  %1645 = vmatpush.bf16.msra.mxu1 %v2599_v33 }
  0x19   :  { %v2582_v37 = vld [vmem:[#allocation2 + $0x180] sm:$0xf]  ;;  %v3591_v39 = vld [vmem:[#allocation2 + $0x18c] sm:$0xf0]  ;;  %v2455_v44 = vor.u32 %v3559_v36, %v2454_v35  ;;  %1658 = vmatpush.bf16.msra.mxu2 %v2727_v34 }
  0x1a   :  { %v2710_v40 = vld [vmem:[#allocation2 + $0x280] sm:$0xf]  ;;  %v3623_v41 = vld [vmem:[#allocation2 + $0x28c] sm:$0xf0]  ;;  %v2583_v45 = vor.u32 %v3591_v39, %v2582_v37  ;;  %1671 = vmatpush.bf16.msra.mxu3 %v2855_v38 }
  0x1b   :  { %v2838_v42 = vld [vmem:[#allocation2 + $0x380] sm:$0xf]  ;;  %v3655_v43 = vld [vmem:[#allocation2 + $0x38c] sm:$0xf0]  ;;  %v2711_v46 = vor.u32 %v3623_v41, %v2710_v40  ;;  %1633 = vmatpush.bf16.msra.mxu0 %v2455_v44 }
  0x1c   :  { %v2438_v47 = vld [vmem:[#allocation2 + $0x60] sm:$0xf]  ;;  %v3555_v48 = vld [vmem:[#allocation2 + $0x6c] sm:$0xf0]  ;;  %v2839_v50 = vor.u32 %v3655_v43, %v2838_v42  ;;  %1646 = vmatpush.bf16.msra.mxu1 %v2583_v45 }
  0x1d   :  { %v2566_v49 = vld [vmem:[#allocation2 + $0x160] sm:$0xf]  ;;  %v3587_v51 = vld [vmem:[#allocation2 + $0x16c] sm:$0xf0]  ;;  %v2439_v56 = vor.u32 %v3555_v48, %v2438_v47  ;;  %1659 = vmatpush.bf16.msra.mxu2 %v2711_v46 }
  0x1e   :  { %v2694_v52 = vld [vmem:[#allocation2 + $0x260] sm:$0xf]  ;;  %v3619_v53 = vld [vmem:[#allocation2 + $0x26c] sm:$0xf0]  ;;  %v2567_v57 = vor.u32 %v3587_v51, %v2566_v49  ;;  %1672 = vmatpush.bf16.msra.mxu3 %v2839_v50 }
  0x1f   :  { %v2822_v54 = vld [vmem:[#allocation2 + $0x360] sm:$0xf]  ;;  %v3651_v55 = vld [vmem:[#allocation2 + $0x36c] sm:$0xf0]  ;;  %v2695_v58 = vor.u32 %v3619_v53, %v2694_v52  ;;  %1634 = vmatpush.bf16.msra.mxu0 %v2439_v56 }
  0x20   :  { %v2422_v59 = vld [vmem:[#allocation2 + $0x40] sm:$0xf]  ;;  %v3551_v60 = vld [vmem:[#allocation2 + $0x4c] sm:$0xf0]  ;;  %v2823_v62 = vor.u32 %v3651_v55, %v2822_v54  ;;  %1647 = vmatpush.bf16.msra.mxu1 %v2567_v57 }
  0x21   :  { %v2550_v61 = vld [vmem:[#allocation2 + $0x140] sm:$0xf]  ;;  %v3583_v63 = vld [vmem:[#allocation2 + $0x14c] sm:$0xf0]  ;;  %v2423_v4 = vor.u32 %v3551_v60, %v2422_v59  ;;  %1660 = vmatpush.bf16.msra.mxu2 %v2695_v58 }
  0x22   :  { %v2678_v0 = vld [vmem:[#allocation2 + $0x240] sm:$0xf]  ;;  %v3615_v1 = vld [vmem:[#allocation2 + $0x24c] sm:$0xf0]  ;;  %v2551_v5 = vor.u32 %v3583_v63, %v2550_v61  ;;  %1673 = vmatpush.bf16.msra.mxu3 %v2823_v62 }
  0x23   :  { %v2806_v2 = vld [vmem:[#allocation2 + $0x340] sm:$0xf]  ;;  %v3647_v3 = vld [vmem:[#allocation2 + $0x34c] sm:$0xf0]  ;;  %v2679_v6 = vor.u32 %v3615_v1, %v2678_v0  ;;  %1635 = vmatpush.bf16.msra.mxu0 %v2423_v4 }
  0x24   :  { %v2406_v7 = vld [vmem:[#allocation2 + $0x20] sm:$0xf]  ;;  %v3547_v8 = vld [vmem:[#allocation2 + $0x2c] sm:$0xf0]  ;;  %v2807_v10 = vor.u32 %v3647_v3, %v2806_v2  ;;  %1648 = vmatpush.bf16.msra.mxu1 %v2551_v5  ;;  %v53_v2 = vld [vmem:[%s4028_s0 + $0x8] sm:$0xff] }
  0x25   :  { %v2534_v9 = vld [vmem:[#allocation2 + $0x120] sm:$0xf]  ;;  %v3579_v11 = vld [vmem:[#allocation2 + $0x12c] sm:$0xf0]  ;;  %v2407_v16 = vor.u32 %v3547_v8, %v2406_v7  ;;  %1661 = vmatpush.bf16.msra.mxu2 %v2679_v6  ;;  %v328_v8 = vunpack.c.l.b16 %v53_v2 }
  0x26   :  { %v2662_v12 = vld [vmem:[#allocation2 + $0x220] sm:$0xf]  ;;  %v3611_v13 = vld [vmem:[#allocation2 + $0x22c] sm:$0xf0]  ;;  %v2535_v19 = vor.u32 %v3579_v11, %v2534_v9  ;;  %1674 = vmatpush.bf16.msra.mxu3 %v2807_v10  ;;  %v329_v10 = vunpack.c.h.b16 %v53_v2 }
  0x27   :  { %v2790_v14 = vld [vmem:[#allocation2 + $0x320] sm:$0xf]  ;;  %v3643_v15 = vld [vmem:[#allocation2 + $0x32c] sm:$0xf0]  ;;  %v2663_v20 = vor.u32 %v3611_v13, %v2662_v12  ;;  %1636 = vmatpush.bf16.msra.mxu0 %v2407_v16 }
  0x28   :  { %v2390_v17 = vld [vmem:[#allocation2] sm:$0xf]  ;;  %v3543_v18 = vld [vmem:[#allocation2 + $0xc] sm:$0xf0]  ;;  %v2791_v24 = vor.u32 %v3643_v15, %v2790_v14  ;;  %1649 = vmatpush.bf16.msra.mxu1 %v2535_v19 }
  0x29   :  { %v2518_v21 = vld [vmem:[#allocation2 + $0x100] sm:$0xf]  ;;  %v3575_v22 = vld [vmem:[#allocation2 + $0x10c] sm:$0xf0]  ;;  %v2391_v31 = vor.u32 %v3543_v18, %v2390_v17  ;;  %1662 = vmatpush.bf16.msra.mxu2 %v2663_v20  ;;  %v3940_v18 = vpack.c.b16 %v328_v8, %v328_v8  ;;  %v3944_v20 = vpack.c.b16 %v329_v10, %v329_v10  ;;  %v3569_v8 = vld [vmem:[#allocation2 + $0xe4] sm:$0xf] }
  0x2a   :  { %v2646_v23 = vld [vmem:[#allocation2 + $0x200] sm:$0xf]  ;;  %v3607_v25 = vld [vmem:[#allocation2 + $0x20c] sm:$0xf0]  ;;  %v2519_v35 = vor.u32 %v3575_v22, %v2518_v21  ;;  %1675 = vmatpush.bf16.msra.mxu3 %v2791_v24  ;;  %v3601_v10 = vld [vmem:[#allocation2 + $0x1e4] sm:$0xf] }
  0x2b   :  { %v2774_v26 = vld [vmem:[#allocation2 + $0x300] sm:$0xf]  ;;  %v3639_v27 = vld [vmem:[#allocation2 + $0x30c] sm:$0xf0]  ;;  %v2647_v36 = vor.u32 %v3607_v25, %v2646_v23  ;;  %1637 = vmatpush.bf16.msra.mxu0 %v2391_v31 }
  0x2c   :  { %v3014_v28 = vld [vmem:[#allocation2 + $0x4e0] sm:$0xf]  ;;  %v3699_v29 = vld [vmem:[#allocation2 + $0x4ec] sm:$0xf0]  ;;  %v2775_v39 = vor.u32 %v3639_v27, %v2774_v26  ;;  %1650 = vmatpush.bf16.msra.mxu1 %v2519_v35 }
  0x2d   :  { %v3142_v30 = vld [vmem:[#allocation2 + $0x5e0] sm:$0xf]  ;;  %v3731_v32 = vld [vmem:[#allocation2 + $0x5ec] sm:$0xf0]  ;;  %v3015_v40 = vor.u32 %v3699_v29, %v3014_v28  ;;  %1663 = vmatpush.bf16.msra.mxu2 %v2647_v36 }
  0x2e   :  { %v3270_v33 = vld [vmem:[#allocation2 + $0x6e0] sm:$0xf]  ;;  %v3763_v34 = vld [vmem:[#allocation2 + $0x6ec] sm:$0xf0]  ;;  %v3143_v41 = vor.u32 %v3731_v32, %v3142_v30  ;;  %1676 = vmatpush.bf16.msra.mxu3 %v2775_v39 }
  0x2f   :  { %v3398_v37 = vld [vmem:[#allocation2 + $0x7e0] sm:$0xf]  ;;  %v3795_v38 = vld [vmem:[#allocation2 + $0x7ec] sm:$0xf0]  ;;  %v3271_v42 = vor.u32 %v3763_v34, %v3270_v33  ;;  %1682 = vmatpush.bf16.msrb.mxu0 %v3015_v40 }
  0x30   :  { %v2998_v43 = vld [vmem:[#allocation2 + $0x4c0] sm:$0xf]  ;;  %v3695_v44 = vld [vmem:[#allocation2 + $0x4cc] sm:$0xf0]  ;;  %v3399_v46 = vor.u32 %v3795_v38, %v3398_v37  ;;  %1695 = vmatpush.bf16.msrb.mxu1 %v3143_v41  ;;  %1664 = vmatmul.bf16.vlgmr.msra.gmra.mxu2 %v3940_v18 }
  0x31   :  { %v3126_v45 = vld [vmem:[#allocation2 + $0x5c0] sm:$0xf]  ;;  %v3727_v47 = vld [vmem:[#allocation2 + $0x5cc] sm:$0xf0]  ;;  %v2999_v52 = vor.u32 %v3695_v44, %v2998_v43  ;;  %1708 = vmatpush.bf16.msrb.mxu2 %v3271_v42  ;;  %1677 = vmatmul.bf16.vlgmr.msra.gmra.mxu3 %v3944_v20 }
  0x32   :  { %v3254_v48 = vld [vmem:[#allocation2 + $0x6c0] sm:$0xf]  ;;  %v3759_v49 = vld [vmem:[#allocation2 + $0x6cc] sm:$0xf0]  ;;  %v3127_v54 = vor.u32 %v3727_v47, %v3126_v45  ;;  %1721 = vmatpush.bf16.msrb.mxu3 %v3399_v46 }
  0x33   :  { %v3382_v50 = vld [vmem:[#allocation2 + $0x7c0] sm:$0xf]  ;;  %v3791_v51 = vld [vmem:[#allocation2 + $0x7cc] sm:$0xf0]  ;;  %v3255_v55 = vor.u32 %v3759_v49, %v3254_v48  ;;  %1683 = vmatpush.bf16.msrb.mxu0 %v2999_v52 }
  0x34   :  { %v2982_v53 = vld [vmem:[#allocation2 + $0x4a0] sm:$0xf]  ;;  %v3691_v56 = vld [vmem:[#allocation2 + $0x4ac] sm:$0xf0]  ;;  %v3383_v59 = vor.u32 %v3791_v51, %v3382_v50  ;;  %1696 = vmatpush.bf16.msrb.mxu1 %v3127_v54 }
  0x35   :  { %v3110_v57 = vld [vmem:[#allocation2 + $0x5a0] sm:$0xf]  ;;  %v3723_v58 = vld [vmem:[#allocation2 + $0x5ac] sm:$0xf0]  ;;  %v2983_v0 = vor.u32 %v3691_v56, %v2982_v53  ;;  %1709 = vmatpush.bf16.msrb.mxu2 %v3255_v55 }
  0x36   :  { %v3238_v60 = vld [vmem:[#allocation2 + $0x6a0] sm:$0xf]  ;;  %v3755_v61 = vld [vmem:[#allocation2 + $0x6ac] sm:$0xf0]  ;;  %v3111_v1 = vor.u32 %v3723_v58, %v3110_v57  ;;  %1722 = vmatpush.bf16.msrb.mxu3 %v3383_v59 }
  0x37   :  { %v3366_v62 = vld [vmem:[#allocation2 + $0x7a0] sm:$0xf]  ;;  %v3787_v63 = vld [vmem:[#allocation2 + $0x7ac] sm:$0xf0]  ;;  %v3239_v4 = vor.u32 %v3755_v61, %v3238_v60  ;;  %1684 = vmatpush.bf16.msrb.mxu0 %v2983_v0 }
  0x38   :  { %v52_v3 = vld [vmem:[%s4028_s0] sm:$0xff]  ;;  %v3687_v6 = vld [vmem:[#allocation2 + $0x48c] sm:$0xf0]  ;;  %v3367_v11 = vor.u32 %v3787_v63, %v3366_v62  ;;  %1697 = vmatpush.bf16.msrb.mxu1 %v3111_v1 }
  0x39   :  { %v2966_v5 = vld [vmem:[#allocation2 + $0x480] sm:$0xf]  ;;  %v326_v9 = vunpack.c.l.b16 %v52_v3  ;;  %v3719_v12 = vld [vmem:[#allocation2 + $0x58c] sm:$0xf0]  ;;  %v327_v15 = vunpack.c.h.b16 %v52_v3  ;;  %1710 = vmatpush.bf16.msrb.mxu2 %v3239_v4  ;;  %v55_v3 = vld [vmem:[%s4028_s0 + $0x18] sm:$0xff] }
  0x3a   :  { %v3094_v7 = vld [vmem:[#allocation2 + $0x580] sm:$0xf]  ;;  %v3751_v14 = vld [vmem:[#allocation2 + $0x68c] sm:$0xf0]  ;;  %v2967_v21 = vor.u32 %v3687_v6, %v2966_v5  ;;  %1723 = vmatpush.bf16.msrb.mxu3 %v3367_v11 }
  0x3b   :  { %v3222_v13 = vld [vmem:[#allocation2 + $0x680] sm:$0xf]  ;;  %v3783_v17 = vld [vmem:[#allocation2 + $0x78c] sm:$0xf0]  ;;  %v3942_v19 = vpack.c.b16 %v326_v9, %v326_v9  ;;  %v3946_v22 = vpack.c.b16 %v327_v15, %v327_v15  ;;  %v3095_v23 = vor.u32 %v3719_v12, %v3094_v7  ;;  %v2504_v9 = vld [vmem:[#allocation2 + $0xf0] sm:$0xf0]  ;;  %v332_v15 = vunpack.c.l.b16 %v55_v3 }
  0x3c   :  { %v3350_v16 = vld [vmem:[#allocation2 + $0x780] sm:$0xf]  ;;  %v3223_v24 = vor.u32 %v3751_v14, %v3222_v13  ;;  %v3683_v26 = vld [vmem:[#allocation2 + $0x46c] sm:$0xf0]  ;;  %1685 = vmatpush.bf16.msrb.mxu0 %v2967_v21  ;;  %v2632_v12 = vld [vmem:[#allocation2 + $0x1f0] sm:$0xf0] }
  0x3d   :  { %v2950_v25 = vld [vmem:[#allocation2 + $0x460] sm:$0xf]  ;;  %v3351_v28 = vor.u32 %v3783_v17, %v3350_v16  ;;  %v3715_v29 = vld [vmem:[#allocation2 + $0x56c] sm:$0xf0]  ;;  %1638 = vmatmul.bf16.vlgmr.msra.gmra.mxu0 %v3942_v19  ;;  %1651 = vmatmul.bf16.vlgmr.msra.gmra.mxu1 %v3946_v22  ;;  %v3633_v13 = vld [vmem:[#allocation2 + $0x2e4] sm:$0xf] }
  0x3e   :  { %v3078_v27 = vld [vmem:[#allocation2 + $0x560] sm:$0xf]  ;;  %v3747_v31 = vld [vmem:[#allocation2 + $0x66c] sm:$0xf0]  ;;  %v2951_v34 = vor.u32 %v3683_v26, %v2950_v25  ;;  %1698 = vmatpush.bf16.msrb.mxu1 %v3095_v23  ;;  %1711 = vmatpush.bf16.msrb.mxu2 %v3223_v24  ;;  %v2760_v14 = vld [vmem:[#allocation2 + $0x2f0] sm:$0xf0]  ;;  %v333_v25 = vunpack.c.h.b16 %v55_v3 }
  0x3f   :  { %v3206_v30 = vld [vmem:[#allocation2 + $0x660] sm:$0xf]  ;;  %v3779_v33 = vld [vmem:[#allocation2 + $0x76c] sm:$0xf0]  ;;  %v3079_v35 = vor.u32 %v3715_v29, %v3078_v27  ;;  %1724 = vmatpush.bf16.msrb.mxu3 %v3351_v28  ;;  %v3665_v21 = vld [vmem:[#allocation2 + $0x3e4] sm:$0xf]  ;;  %v2507_v27 = vor.u32 %v3569_v8, %v2504_v9  ;;  %v2635_v29 = vor.u32 %v3601_v10, %v2632_v12 }
  0x40   :  { %v3334_v32 = vld [vmem:[#allocation2 + $0x760] sm:$0xf]  ;;  %v3207_v36 = vor.u32 %v3747_v31, %v3206_v30  ;;  %v3679_v38 = vld [vmem:[#allocation2 + $0x44c] sm:$0xf0]  ;;  %1686 = vmatpush.bf16.msrb.mxu0 %v2951_v34  ;;  %v2888_v23 = vld [vmem:[#allocation2 + $0x3f0] sm:$0xf0]  ;;  %v2763_v30 = vor.u32 %v3633_v13, %v2760_v14 }
  0x41   :  { %v2934_v37 = vld [vmem:[#allocation2 + $0x440] sm:$0xf]  ;;  %v3335_v40 = vor.u32 %v3779_v33, %v3334_v32  ;;  %v3711_v41 = vld [vmem:[#allocation2 + $0x54c] sm:$0xf0]  ;;  %v3565_v31 = vld [vmem:[#allocation2 + $0xc4] sm:$0xf]  ;;  %v2891_v34 = vor.u32 %v3665_v21, %v2888_v23 }
  0x42   :  { %v3062_v39 = vld [vmem:[#allocation2 + $0x540] sm:$0xf]  ;;  %v3743_v43 = vld [vmem:[#allocation2 + $0x64c] sm:$0xf0]  ;;  %v2935_v46 = vor.u32 %v3679_v38, %v2934_v37  ;;  %1699 = vmatpush.bf16.msrb.mxu1 %v3079_v35  ;;  %1712 = vmatpush.bf16.msrb.mxu2 %v3207_v36  ;;  %v2488_v32 = vld [vmem:[#allocation2 + $0xd0] sm:$0xf0]  ;;  %v3958_v38 = vpack.c.b16 %v332_v15, %v332_v15 }
  0x43   :  { %v3190_v42 = vld [vmem:[#allocation2 + $0x640] sm:$0xf]  ;;  %v3775_v45 = vld [vmem:[#allocation2 + $0x74c] sm:$0xf0]  ;;  %v3063_v47 = vor.u32 %v3711_v41, %v3062_v39  ;;  %1725 = vmatpush.bf16.msrb.mxu3 %v3335_v40  ;;  %v3597_v33 = vld [vmem:[#allocation2 + $0x1c4] sm:$0xf] }
  0x44   :  { %v3318_v44 = vld [vmem:[#allocation2 + $0x740] sm:$0xf]  ;;  %v3191_v48 = vor.u32 %v3743_v43, %v3190_v42  ;;  %v3675_v50 = vld [vmem:[#allocation2 + $0x42c] sm:$0xf0]  ;;  %1687 = vmatpush.bf16.msrb.mxu0 %v2935_v46  ;;  %v2616_v35 = vld [vmem:[#allocation2 + $0x1d0] sm:$0xf0]  ;;  %v3962_v42 = vpack.c.b16 %v333_v25, %v333_v25  ;;  %v2491_v43 = vor.u32 %v3565_v31, %v2488_v32 }
  0x45   :  { %v2918_v49 = vld [vmem:[#allocation2 + $0x420] sm:$0xf]  ;;  %v3319_v52 = vor.u32 %v3775_v45, %v3318_v44  ;;  %v3707_v53 = vld [vmem:[#allocation2 + $0x52c] sm:$0xf0]  ;;  %v3629_v36 = vld [vmem:[#allocation2 + $0x2c4] sm:$0xf]  ;;  %v2619_v45 = vor.u32 %v3597_v33, %v2616_v35 }
  0x46   :  { %v3046_v51 = vld [vmem:[#allocation2 + $0x520] sm:$0xf]  ;;  %v3739_v55 = vld [vmem:[#allocation2 + $0x62c] sm:$0xf0]  ;;  %v2919_v59 = vor.u32 %v3675_v50, %v2918_v49  ;;  %1700 = vmatpush.bf16.msrb.mxu1 %v3063_v47  ;;  %1713 = vmatpush.bf16.msrb.mxu2 %v3191_v48  ;;  %v2744_v37 = vld [vmem:[#allocation2 + $0x2d0] sm:$0xf0] }
  0x47   :  { %v3174_v54 = vld [vmem:[#allocation2 + $0x620] sm:$0xf]  ;;  %v3771_v57 = vld [vmem:[#allocation2 + $0x72c] sm:$0xf0]  ;;  %v3047_v63 = vor.u32 %v3707_v53, %v3046_v51  ;;  %1726 = vmatpush.bf16.msrb.mxu3 %v3319_v52  ;;  %v3661_v39 = vld [vmem:[#allocation2 + $0x3c4] sm:$0xf]  ;;  %v2747_v46 = vor.u32 %v3629_v36, %v2744_v37 }
  0x48   :  { %v3302_v56 = vld [vmem:[#allocation2 + $0x720] sm:$0xf]  ;;  %v3671_v60 = vld [vmem:[#allocation2 + $0x40c] sm:$0xf0]  ;;  %v3175_v0 = vor.u32 %v3739_v55, %v3174_v54  ;;  %1688 = vmatpush.bf16.msrb.mxu0 %v2919_v59  ;;  %v2872_v40 = vld [vmem:[#allocation2 + $0x3d0] sm:$0xf0] }
  0x49   :  { %v2902_v58 = vld [vmem:[#allocation2 + $0x400] sm:$0xf]  ;;  %v3703_v62 = vld [vmem:[#allocation2 + $0x50c] sm:$0xf0]  ;;  %v3303_v4 = vor.u32 %v3771_v57, %v3302_v56  ;;  %v3561_v47 = vld [vmem:[#allocation2 + $0xa4] sm:$0xf]  ;;  %v2875_v50 = vor.u32 %v3661_v39, %v2872_v40 }
  0x4a   :  { %v3030_v61 = vld [vmem:[#allocation2 + $0x500] sm:$0xf]  ;;  %v3735_v2 = vld [vmem:[#allocation2 + $0x60c] sm:$0xf0]  ;;  %v2903_v11 = vor.u32 %v3671_v60, %v2902_v58  ;;  %1701 = vmatpush.bf16.msrb.mxu1 %v3047_v63  ;;  %1714 = vmatpush.bf16.msrb.mxu2 %v3175_v0  ;;  %v2472_v48 = vld [vmem:[#allocation2 + $0xb0] sm:$0xf0] }
  0x4b   :  { %v3158_v1 = vld [vmem:[#allocation2 + $0x600] sm:$0xf]  ;;  %v3767_v6 = vld [vmem:[#allocation2 + $0x70c] sm:$0xf0]  ;;  %v3031_v16 = vor.u32 %v3703_v62, %v3030_v61  ;;  %1727 = vmatpush.bf16.msrb.mxu3 %v3303_v4  ;;  %v3593_v49 = vld [vmem:[#allocation2 + $0x1a4] sm:$0xf]  ;;  %v2475_v56 = vor.u32 %v3561_v47, %v2472_v48 }
  0x4c   :  { %v3286_v5 = vld [vmem:[#allocation2 + $0x700] sm:$0xf]  ;;  %v54_v7 = vld [vmem:[%s4028_s0 + $0x10] sm:$0xff]  ;;  %v3159_v17 = vor.u32 %v3735_v2, %v3158_v1  ;;  %1689 = vmatpush.bf16.msrb.mxu0 %v2903_v11  ;;  %v3625_v52 = vld [vmem:[#allocation2 + $0x2a4] sm:$0xf] }
  0x4d   :  { %v330_v24 = vunpack.c.l.b16 %v54_v7  ;;  %v3287_v26 = vor.u32 %v3767_v6, %v3286_v5  ;;  %v331_v28 = vunpack.c.h.b16 %v54_v7  ;;  %v2600_v51 = vld [vmem:[#allocation2 + $0x1b0] sm:$0xf0]  ;;  %v3657_v54 = vld [vmem:[#allocation2 + $0x3a4] sm:$0xf] }
  0x4e   :  { %1702 = vmatpush.bf16.msrb.mxu1 %v3031_v16  ;;  %1715 = vmatpush.bf16.msrb.mxu2 %v3159_v17  ;;  %v2728_v53 = vld [vmem:[#allocation2 + $0x2b0] sm:$0xf0]  ;;  %v2603_v57 = vor.u32 %v3593_v49, %v2600_v51  ;;  %v3557_v59 = vld [vmem:[#allocation2 + $0x84] sm:$0xf] }
  0x4f   :  { %v3960_v41 = vpack.c.b16 %v330_v24, %v330_v24  ;;  %1728 = vmatpush.bf16.msrb.mxu3 %v3287_v26  ;;  %v3964_v44 = vpack.c.b16 %v331_v28, %v331_v28  ;;  %v2856_v55 = vld [vmem:[#allocation2 + $0x3b0] sm:$0xf0]  ;;  %v2731_v58 = vor.u32 %v3625_v52, %v2728_v53  ;;  %v3589_v61 = vld [vmem:[#allocation2 + $0x184] sm:$0xf] }
  0x50   :  { %1734 = vmatpush.bf16.msra.mxu0 %v2507_v27  ;;  %v2456_v60 = vld [vmem:[#allocation2 + $0x90] sm:$0xf0]  ;;  %v2859_v62 = vor.u32 %v3657_v54, %v2856_v55  ;;  %v3621_v0 = vld [vmem:[#allocation2 + $0x284] sm:$0xf] }
  0x51   :  { %1716 = vmatmul.bf16.vlgmr.msrb.gmra.mxu2 %v3958_v38  ;;  %1690 = vmatmul.bf16.vlgmr.msrb.gmra.mxu0 %v3960_v41  ;;  %v2584_v63 = vld [vmem:[#allocation2 + $0x190] sm:$0xf0]  ;;  %v3653_v2 = vld [vmem:[#allocation2 + $0x384] sm:$0xf]  ;;  %v2459_v4 = vor.u32 %v3557_v59, %v2456_v60 }
  0x52   :  { %1747 = vmatpush.bf16.msra.mxu1 %v2635_v29  ;;  %1760 = vmatpush.bf16.msra.mxu2 %v2763_v30  ;;  %v2712_v1 = vld [vmem:[#allocation2 + $0x290] sm:$0xf0]  ;;  %v2587_v5 = vor.u32 %v3589_v61, %v2584_v63  ;;  %v3553_v7 = vld [vmem:[#allocation2 + $0x64] sm:$0xf] }
  0x53   :  { %1773 = vmatpush.bf16.msra.mxu3 %v2891_v34  ;;  %1703 = vmatmul.bf16.vlgmr.msrb.gmra.mxu1 %v3964_v44  ;;  %v2840_v3 = vld [vmem:[#allocation2 + $0x390] sm:$0xf0]  ;;  %v2715_v6 = vor.u32 %v3621_v0, %v2712_v1  ;;  %v3585_v9 = vld [vmem:[#allocation2 + $0x164] sm:$0xf] }
  0x54   :  { %1729 = vmatmul.bf16.vlgmr.msrb.gmra.mxu3 %v3962_v42  ;;  %1735 = vmatpush.bf16.msra.mxu0 %v2491_v43  ;;  %v2440_v8 = vld [vmem:[#allocation2 + $0x70] sm:$0xf0]  ;;  %v2843_v10 = vor.u32 %v3653_v2, %v2840_v3  ;;  %v3617_v12 = vld [vmem:[#allocation2 + $0x264] sm:$0xf] }
  0x55   :  { %v2568_v11 = vld [vmem:[#allocation2 + $0x170] sm:$0xf0]  ;;  %v3649_v14 = vld [vmem:[#allocation2 + $0x364] sm:$0xf]  ;;  %v2443_v16 = vor.u32 %v3553_v7, %v2440_v8 }
  0x56   :  { %1748 = vmatpush.bf16.msra.mxu1 %v2619_v45  ;;  %1761 = vmatpush.bf16.msra.mxu2 %v2747_v46  ;;  %v2696_v13 = vld [vmem:[#allocation2 + $0x270] sm:$0xf0]  ;;  %v2571_v17 = vor.u32 %v3585_v9, %v2568_v11  ;;  %v3549_v23 = vld [vmem:[#allocation2 + $0x44] sm:$0xf] }
  0x57   :  { %1774 = vmatpush.bf16.msra.mxu3 %v2875_v50  ;;  %v2824_v15 = vld [vmem:[#allocation2 + $0x370] sm:$0xf0]  ;;  %v2699_v21 = vor.u32 %v3617_v12, %v2696_v13  ;;  %v3581_v25 = vld [vmem:[#allocation2 + $0x144] sm:$0xf] }
  0x58   :  { %1736 = vmatpush.bf16.msra.mxu0 %v2475_v56  ;;  %v2424_v24 = vld [vmem:[#allocation2 + $0x50] sm:$0xf0]  ;;  %v2827_v26 = vor.u32 %v3649_v14, %v2824_v15  ;;  %v3613_v28 = vld [vmem:[#allocation2 + $0x244] sm:$0xf] }
  0x59   :  { %v2552_v27 = vld [vmem:[#allocation2 + $0x150] sm:$0xf0]  ;;  %v3645_v30 = vld [vmem:[#allocation2 + $0x344] sm:$0xf]  ;;  %v2427_v32 = vor.u32 %v3549_v23, %v2424_v24 }
  0x5a   :  { %1749 = vmatpush.bf16.msra.mxu1 %v2603_v57  ;;  %1762 = vmatpush.bf16.msra.mxu2 %v2731_v58  ;;  %v2680_v29 = vld [vmem:[#allocation2 + $0x250] sm:$0xf0]  ;;  %v2555_v33 = vor.u32 %v3581_v25, %v2552_v27  ;;  %v3545_v35 = vld [vmem:[#allocation2 + $0x24] sm:$0xf] }
  0x5b   :  { %1775 = vmatpush.bf16.msra.mxu3 %v2859_v62  ;;  %v2808_v31 = vld [vmem:[#allocation2 + $0x350] sm:$0xf0]  ;;  %v2683_v34 = vor.u32 %v3613_v28, %v2680_v29  ;;  %v3577_v37 = vld [vmem:[#allocation2 + $0x124] sm:$0xf] }
  0x5c   :  { %1737 = vmatpush.bf16.msra.mxu0 %v2459_v4  ;;  %v2408_v36 = vld [vmem:[#allocation2 + $0x30] sm:$0xf0]  ;;  %v2811_v39 = vor.u32 %v3645_v30, %v2808_v31  ;;  %v3609_v43 = vld [vmem:[#allocation2 + $0x224] sm:$0xf] }
  0x5d   :  { %v2536_v40 = vld [vmem:[#allocation2 + $0x130] sm:$0xf0]  ;;  %v3641_v46 = vld [vmem:[#allocation2 + $0x324] sm:$0xf]  ;;  %v2411_v48 = vor.u32 %v3545_v35, %v2408_v36 }
  0x5e   :  { %1750 = vmatpush.bf16.msra.mxu1 %v2587_v5  ;;  %1763 = vmatpush.bf16.msra.mxu2 %v2715_v6  ;;  %v2664_v45 = vld [vmem:[#allocation2 + $0x230] sm:$0xf0]  ;;  %v3541_v49 = vld [vmem:[#allocation2 + $0x4] sm:$0xf]  ;;  %v2539_v51 = vor.u32 %v3577_v37, %v2536_v40 }
  0x5f   :  { %1776 = vmatpush.bf16.msra.mxu3 %v2843_v10  ;;  %v2792_v47 = vld [vmem:[#allocation2 + $0x330] sm:$0xf0]  ;;  %v2667_v52 = vor.u32 %v3609_v43, %v2664_v45  ;;  %v3573_v53 = vld [vmem:[#allocation2 + $0x104] sm:$0xf] }
  0x60   :  { %1738 = vmatpush.bf16.msra.mxu0 %v2443_v16  ;;  %v2392_v50 = vld [vmem:[#allocation2 + $0x10] sm:$0xf0]  ;;  %v3605_v55 = vld [vmem:[#allocation2 + $0x204] sm:$0xf]  ;;  %v2795_v56 = vor.u32 %v3641_v46, %v2792_v47 }
  0x61   :  { %v2520_v54 = vld [vmem:[#allocation2 + $0x110] sm:$0xf0]  ;;  %v3637_v58 = vld [vmem:[#allocation2 + $0x304] sm:$0xf]  ;;  %v2395_v63 = vor.u32 %v3541_v49, %v2392_v50 }
  0x62   :  { %1751 = vmatpush.bf16.msra.mxu1 %v2571_v17  ;;  %1764 = vmatpush.bf16.msra.mxu2 %v2699_v21  ;;  %v2648_v57 = vld [vmem:[#allocation2 + $0x210] sm:$0xf0]  ;;  %v3697_v60 = vld [vmem:[#allocation2 + $0x4e4] sm:$0xf]  ;;  %v2523_v3 = vor.u32 %v3573_v53, %v2520_v54 }
  0x63   :  { %1777 = vmatpush.bf16.msra.mxu3 %v2827_v26  ;;  %v2776_v59 = vld [vmem:[#allocation2 + $0x310] sm:$0xf0]  ;;  %v3729_v62 = vld [vmem:[#allocation2 + $0x5e4] sm:$0xf]  ;;  %v2651_v4 = vor.u32 %v3605_v55, %v2648_v57 }
  0x64   :  { %1739 = vmatpush.bf16.msra.mxu0 %v2427_v32  ;;  %v3016_v61 = vld [vmem:[#allocation2 + $0x4f0] sm:$0xf0]  ;;  %v3761_v1 = vld [vmem:[#allocation2 + $0x6e4] sm:$0xf]  ;;  %v2779_v7 = vor.u32 %v3637_v58, %v2776_v59 }
  0x65   :  { %v3144_v0 = vld [vmem:[#allocation2 + $0x5f0] sm:$0xf0]  ;;  %v3793_v5 = vld [vmem:[#allocation2 + $0x7e4] sm:$0xf]  ;;  %v3019_v8 = vor.u32 %v3697_v60, %v3016_v61 }
  0x66   :  { %1752 = vmatpush.bf16.msra.mxu1 %v2555_v33  ;;  %1765 = vmatpush.bf16.msra.mxu2 %v2683_v34  ;;  %v3272_v2 = vld [vmem:[#allocation2 + $0x6f0] sm:$0xf0]  ;;  %v3147_v9 = vor.u32 %v3729_v62, %v3144_v0  ;;  %v3693_v11 = vld [vmem:[#allocation2 + $0x4c4] sm:$0xf] }
  0x67   :  { %1778 = vmatpush.bf16.msra.mxu3 %v2811_v39  ;;  %v3400_v6 = vld [vmem:[#allocation2 + $0x7f0] sm:$0xf0]  ;;  %v3275_v10 = vor.u32 %v3761_v1, %v3272_v2  ;;  %v3725_v13 = vld [vmem:[#allocation2 + $0x5c4] sm:$0xf] }
  0x68   :  { %1740 = vmatpush.bf16.msra.mxu0 %v2411_v48  ;;  %v3000_v12 = vld [vmem:[#allocation2 + $0x4d0] sm:$0xf0]  ;;  %v3403_v14 = vor.u32 %v3793_v5, %v3400_v6  ;;  %v3757_v16 = vld [vmem:[#allocation2 + $0x6c4] sm:$0xf] }
  0x69   :  { %v3128_v15 = vld [vmem:[#allocation2 + $0x5d0] sm:$0xf0]  ;;  %v3789_v21 = vld [vmem:[#allocation2 + $0x7c4] sm:$0xf]  ;;  %v3003_v24 = vor.u32 %v3693_v11, %v3000_v12 }
  0x6a   :  { %1753 = vmatpush.bf16.msra.mxu1 %v2539_v51  ;;  %1766 = vmatpush.bf16.msra.mxu2 %v2667_v52  ;;  %v3256_v17 = vld [vmem:[#allocation2 + $0x6d0] sm:$0xf0]  ;;  %v3131_v25 = vor.u32 %v3725_v13, %v3128_v15  ;;  %v3689_v27 = vld [vmem:[#allocation2 + $0x4a4] sm:$0xf] }
  0x6b   :  { %1779 = vmatpush.bf16.msra.mxu3 %v2795_v56  ;;  %v3384_v23 = vld [vmem:[#allocation2 + $0x7d0] sm:$0xf0]  ;;  %v3259_v26 = vor.u32 %v3757_v16, %v3256_v17  ;;  %v3721_v29 = vld [vmem:[#allocation2 + $0x5a4] sm:$0xf] }
  0x6c   :  { %1741 = vmatpush.bf16.msra.mxu0 %v2395_v63  ;;  %v2984_v28 = vld [vmem:[#allocation2 + $0x4b0] sm:$0xf0]  ;;  %v3387_v30 = vor.u32 %v3789_v21, %v3384_v23  ;;  %v3753_v32 = vld [vmem:[#allocation2 + $0x6a4] sm:$0xf] }
  0x6d   :  { %v3112_v31 = vld [vmem:[#allocation2 + $0x5b0] sm:$0xf0]  ;;  %v3785_v34 = vld [vmem:[#allocation2 + $0x7a4] sm:$0xf]  ;;  %v2987_v36 = vor.u32 %v3689_v27, %v2984_v28 }
  0x6e   :  { %1754 = vmatpush.bf16.msra.mxu1 %v2523_v3  ;;  %1767 = vmatpush.bf16.msra.mxu2 %v2651_v4  ;;  %v3240_v33 = vld [vmem:[#allocation2 + $0x6b0] sm:$0xf0]  ;;  %v3115_v37 = vor.u32 %v3721_v29, %v3112_v31  ;;  %v3685_v40 = vld [vmem:[#allocation2 + $0x484] sm:$0xf] }
  0x6f   :  { %1780 = vmatpush.bf16.msra.mxu3 %v2779_v7  ;;  %v3368_v35 = vld [vmem:[#allocation2 + $0x7b0] sm:$0xf0]  ;;  %1742 = vmatmul.bf16.vlgmr.msra.gmra.mxu0 %v3942_v19  ;;  %v3243_v39 = vor.u32 %v3753_v32, %v3240_v33  ;;  %v3717_v45 = vld [vmem:[#allocation2 + $0x584] sm:$0xf] }
  0x70   :  { %1786 = vmatpush.bf16.msrb.mxu0 %v3019_v8  ;;  %v2968_v43 = vld [vmem:[#allocation2 + $0x490] sm:$0xf0]  ;;  %v3371_v46 = vor.u32 %v3785_v34, %v3368_v35  ;;  %v3749_v48 = vld [vmem:[#allocation2 + $0x684] sm:$0xf] }
  0x71   :  { %1768 = vmatmul.bf16.vlgmr.msra.gmra.mxu2 %v3940_v18  ;;  %1755 = vmatmul.bf16.vlgmr.msra.gmra.mxu1 %v3946_v22  ;;  %v3096_v47 = vld [vmem:[#allocation2 + $0x590] sm:$0xf0]  ;;  %v3781_v50 = vld [vmem:[#allocation2 + $0x784] sm:$0xf]  ;;  %v2971_v52 = vor.u32 %v3685_v40, %v2968_v43  ;;  %v2510_v43 = vld [vmem:[#allocation2 + $0xe8] sm:$0xf] }
  0x72   :  { %1799 = vmatpush.bf16.msrb.mxu1 %v3147_v9  ;;  %1812 = vmatpush.bf16.msrb.mxu2 %v3275_v10  ;;  %v3224_v49 = vld [vmem:[#allocation2 + $0x690] sm:$0xf0]  ;;  %v3099_v53 = vor.u32 %v3717_v45, %v3096_v47  ;;  %v3681_v55 = vld [vmem:[#allocation2 + $0x464] sm:$0xf]  ;;  %v3572_v45 = vld [vmem:[#allocation2 + $0xf4] sm:$0xf0] }
  0x73   :  { %1825 = vmatpush.bf16.msrb.mxu3 %v3403_v14  ;;  %v3352_v51 = vld [vmem:[#allocation2 + $0x790] sm:$0xf0]  ;;  %v3227_v54 = vor.u32 %v3749_v48, %v3224_v49  ;;  %v3713_v57 = vld [vmem:[#allocation2 + $0x564] sm:$0xf]  ;;  %v3604_v48 = vld [vmem:[#allocation2 + $0x1f4] sm:$0xf0] }
  0x74   :  { %1781 = vmatmul.bf16.vlgmr.msra.gmra.mxu3 %v3944_v20  ;;  %1787 = vmatpush.bf16.msrb.mxu0 %v3003_v24  ;;  %v2952_v56 = vld [vmem:[#allocation2 + $0x470] sm:$0xf0]  ;;  %v3355_v58 = vor.u32 %v3781_v50, %v3352_v51  ;;  %v3745_v60 = vld [vmem:[#allocation2 + $0x664] sm:$0xf]  ;;  %v2766_v49 = vld [vmem:[#allocation2 + $0x2e8] sm:$0xf] }
  0x75   :  { %v3080_v59 = vld [vmem:[#allocation2 + $0x570] sm:$0xf0]  ;;  %v3777_v62 = vld [vmem:[#allocation2 + $0x764] sm:$0xf]  ;;  %v2955_v0 = vor.u32 %v3681_v55, %v2952_v56  ;;  %v3636_v50 = vld [vmem:[#allocation2 + $0x2f4] sm:$0xf0]  ;;  %v2511_v56 = vor.u32 %v3572_v45, %v2510_v43 }
  0x76   :  { %1800 = vmatpush.bf16.msrb.mxu1 %v3131_v25  ;;  %1813 = vmatpush.bf16.msrb.mxu2 %v3259_v26  ;;  %v3208_v61 = vld [vmem:[#allocation2 + $0x670] sm:$0xf0]  ;;  %v3083_v1 = vor.u32 %v3713_v57, %v3080_v59  ;;  %v3677_v3 = vld [vmem:[#allocation2 + $0x444] sm:$0xf]  ;;  %v2494_v59 = vld [vmem:[#allocation2 + $0xc8] sm:$0xf] }
  0x77   :  { %1826 = vmatpush.bf16.msrb.mxu3 %v3387_v30  ;;  %v3336_v63 = vld [vmem:[#allocation2 + $0x770] sm:$0xf0]  ;;  %v3211_v2 = vor.u32 %v3745_v60, %v3208_v61  ;;  %v3709_v5 = vld [vmem:[#allocation2 + $0x544] sm:$0xf]  ;;  %v3568_v60 = vld [vmem:[#allocation2 + $0xd4] sm:$0xf0] }
  0x78   :  { %1788 = vmatpush.bf16.msrb.mxu0 %v2987_v36  ;;  %v2936_v4 = vld [vmem:[#allocation2 + $0x450] sm:$0xf0]  ;;  %v3339_v6 = vor.u32 %v3777_v62, %v3336_v63  ;;  %v3741_v8 = vld [vmem:[#allocation2 + $0x644] sm:$0xf]  ;;  %v2622_v61 = vld [vmem:[#allocation2 + $0x1c8] sm:$0xf] }
  0x79   :  { %v3064_v7 = vld [vmem:[#allocation2 + $0x550] sm:$0xf0]  ;;  %v3773_v10 = vld [vmem:[#allocation2 + $0x744] sm:$0xf]  ;;  %v2939_v12 = vor.u32 %v3677_v3, %v2936_v4  ;;  %v3600_v63 = vld [vmem:[#allocation2 + $0x1d4] sm:$0xf0]  ;;  %v2495_v4 = vor.u32 %v3568_v60, %v2494_v59 }
  0x7a   :  { %1801 = vmatpush.bf16.msrb.mxu1 %v3115_v37  ;;  %1814 = vmatpush.bf16.msrb.mxu2 %v3243_v39  ;;  %v3192_v9 = vld [vmem:[#allocation2 + $0x650] sm:$0xf0]  ;;  %v3067_v13 = vor.u32 %v3709_v5, %v3064_v7  ;;  %v3673_v15 = vld [vmem:[#allocation2 + $0x424] sm:$0xf]  ;;  %v3664_v3 = vld [vmem:[#allocation2 + $0x3d4] sm:$0xf0]  ;;  %v2623_v5 = vor.u32 %v3600_v63, %v2622_v61 }
  0x7b   :  { %1827 = vmatpush.bf16.msrb.mxu3 %v3371_v46  ;;  %v3320_v11 = vld [vmem:[#allocation2 + $0x750] sm:$0xf0]  ;;  %v3195_v14 = vor.u32 %v3741_v8, %v3192_v9  ;;  %v3705_v17 = vld [vmem:[#allocation2 + $0x524] sm:$0xf]  ;;  %v2638_v46 = vld [vmem:[#allocation2 + $0x1e8] sm:$0xf] }
  0x7c   :  { %1789 = vmatpush.bf16.msrb.mxu0 %v2971_v52  ;;  %v2920_v16 = vld [vmem:[#allocation2 + $0x430] sm:$0xf0]  ;;  %v3323_v21 = vor.u32 %v3773_v10, %v3320_v11  ;;  %v3737_v24 = vld [vmem:[#allocation2 + $0x624] sm:$0xf]  ;;  %v2639_v57 = vor.u32 %v3604_v48, %v2638_v46  ;;  %v2478_v7 = vld [vmem:[#allocation2 + $0xa8] sm:$0xf] }
  0x7d   :  { %v3048_v23 = vld [vmem:[#allocation2 + $0x530] sm:$0xf0]  ;;  %v3769_v26 = vld [vmem:[#allocation2 + $0x724] sm:$0xf]  ;;  %v2923_v28 = vor.u32 %v3673_v15, %v2920_v16  ;;  %v3564_v8 = vld [vmem:[#allocation2 + $0xb4] sm:$0xf0] }
  0x7e   :  { %1802 = vmatpush.bf16.msrb.mxu1 %v3099_v53  ;;  %1815 = vmatpush.bf16.msrb.mxu2 %v3227_v54  ;;  %v3176_v25 = vld [vmem:[#allocation2 + $0x630] sm:$0xf0]  ;;  %v3669_v29 = vld [vmem:[#allocation2 + $0x404] sm:$0xf]  ;;  %v3051_v31 = vor.u32 %v3705_v17, %v3048_v23  ;;  %v2894_v53 = vld [vmem:[#allocation2 + $0x3e8] sm:$0xf]  ;;  %v2479_v16 = vor.u32 %v3564_v8, %v2478_v7 }
  0x7f   :  { %1828 = vmatpush.bf16.msrb.mxu3 %v3355_v58  ;;  %v3304_v27 = vld [vmem:[#allocation2 + $0x730] sm:$0xf0]  ;;  %v3179_v32 = vor.u32 %v3737_v24, %v3176_v25  ;;  %v3701_v33 = vld [vmem:[#allocation2 + $0x504] sm:$0xf]  ;;  %v3668_v54 = vld [vmem:[#allocation2 + $0x3f4] sm:$0xf0]  ;;  %v2767_v58 = vor.u32 %v3636_v50, %v2766_v49 }
  0x80   :  { %1790 = vmatpush.bf16.msrb.mxu0 %v2955_v0  ;;  %v2904_v30 = vld [vmem:[#allocation2 + $0x410] sm:$0xf0]  ;;  %v3733_v35 = vld [vmem:[#allocation2 + $0x604] sm:$0xf]  ;;  %v3307_v36 = vor.u32 %v3769_v26, %v3304_v27  ;;  %v2895_v62 = vor.u32 %v3668_v54, %v2894_v53  ;;  %v2750_v0 = vld [vmem:[#allocation2 + $0x2c8] sm:$0xf] }
  0x81   :  { %v3032_v34 = vld [vmem:[#allocation2 + $0x510] sm:$0xf0]  ;;  %v3765_v39 = vld [vmem:[#allocation2 + $0x704] sm:$0xf]  ;;  %v2907_v47 = vor.u32 %v3669_v29, %v2904_v30  ;;  %v2606_v9 = vld [vmem:[#allocation2 + $0x1a8] sm:$0xf] }
  0x82   :  { %1803 = vmatpush.bf16.msrb.mxu1 %v3083_v1  ;;  %1816 = vmatpush.bf16.msrb.mxu2 %v3211_v2  ;;  %v3160_v37 = vld [vmem:[#allocation2 + $0x610] sm:$0xf0]  ;;  %v3035_v51 = vor.u32 %v3701_v33, %v3032_v34  ;;  %v3632_v1 = vld [vmem:[#allocation2 + $0x2d4] sm:$0xf0]  ;;  %v2878_v2 = vld [vmem:[#allocation2 + $0x3c8] sm:$0xf] }
  0x83   :  { %1829 = vmatpush.bf16.msrb.mxu3 %v3339_v6  ;;  %v3288_v40 = vld [vmem:[#allocation2 + $0x710] sm:$0xf0]  ;;  %v3163_v52 = vor.u32 %v3733_v35, %v3160_v37  ;;  %v2751_v6 = vor.u32 %v3632_v1, %v2750_v0  ;;  %v2879_v10 = vor.u32 %v3664_v3, %v2878_v2  ;;  %v3596_v11 = vld [vmem:[#allocation2 + $0x1b4] sm:$0xf0]  ;;  %v2462_v23 = vld [vmem:[#allocation2 + $0x88] sm:$0xf] }
  0x84   :  { %1791 = vmatpush.bf16.msrb.mxu0 %v2939_v12  ;;  %v3291_v55 = vor.u32 %v3765_v39, %v3288_v40  ;;  %v2734_v12 = vld [vmem:[#allocation2 + $0x2a8] sm:$0xf]  ;;  %v3660_v15 = vld [vmem:[#allocation2 + $0x3b4] sm:$0xf0]  ;;  %v2607_v17 = vor.u32 %v3596_v11, %v2606_v9 }
  0x85   :  { %v3560_v24 = vld [vmem:[#allocation2 + $0x94] sm:$0xf0]  ;;  %v2590_v25 = vld [vmem:[#allocation2 + $0x188] sm:$0xf] }
  0x86   :  { %1804 = vmatpush.bf16.msrb.mxu1 %v3067_v13  ;;  %1817 = vmatpush.bf16.msrb.mxu2 %v3195_v14  ;;  %v3628_v13 = vld [vmem:[#allocation2 + $0x2b4] sm:$0xf0]  ;;  %v2862_v14 = vld [vmem:[#allocation2 + $0x3a8] sm:$0xf] }
  0x87   :  { %1830 = vmatpush.bf16.msrb.mxu3 %v3323_v21  ;;  %v2735_v21 = vor.u32 %v3628_v13, %v2734_v12  ;;  %v2863_v26 = vor.u32 %v3660_v15, %v2862_v14  ;;  %v3592_v27 = vld [vmem:[#allocation2 + $0x194] sm:$0xf0]  ;;  %v2846_v30 = vld [vmem:[#allocation2 + $0x388] sm:$0xf] }
  0x88   :  { %1792 = vmatpush.bf16.msrb.mxu0 %v2923_v28  ;;  %v2718_v28 = vld [vmem:[#allocation2 + $0x288] sm:$0xf]  ;;  %v3624_v29 = vld [vmem:[#allocation2 + $0x294] sm:$0xf0]  ;;  %v2591_v33 = vor.u32 %v3592_v27, %v2590_v25 }
  0x89   :  { %v2719_v34 = vor.u32 %v3624_v29, %v2718_v28  ;;  %v2446_v35 = vld [vmem:[#allocation2 + $0x68] sm:$0xf]  ;;  %v3588_v40 = vld [vmem:[#allocation2 + $0x174] sm:$0xf0] }
  0x8a   :  { %1805 = vmatpush.bf16.msrb.mxu1 %v3051_v31  ;;  %1818 = vmatpush.bf16.msrb.mxu2 %v3179_v32  ;;  %v3656_v31 = vld [vmem:[#allocation2 + $0x394] sm:$0xf0]  ;;  %v2463_v32 = vor.u32 %v3560_v24, %v2462_v23  ;;  %v2574_v37 = vld [vmem:[#allocation2 + $0x168] sm:$0xf] }
  0x8b   :  { %1831 = vmatpush.bf16.msrb.mxu3 %v3307_v36  ;;  %v3556_v36 = vld [vmem:[#allocation2 + $0x74] sm:$0xf0]  ;;  %v2847_v39 = vor.u32 %v3656_v31, %v2846_v30  ;;  %v2702_v43 = vld [vmem:[#allocation2 + $0x268] sm:$0xf]  ;;  %v2575_v49 = vor.u32 %v3588_v40, %v2574_v37 }
  0x8c   :  { %1793 = vmatpush.bf16.msrb.mxu0 %v2907_v47  ;;  %v3620_v45 = vld [vmem:[#allocation2 + $0x274] sm:$0xf0]  ;;  %v2830_v46 = vld [vmem:[#allocation2 + $0x368] sm:$0xf]  ;;  %v2447_v48 = vor.u32 %v3556_v36, %v2446_v35 }
  0x8d   :  { %v3652_v47 = vld [vmem:[#allocation2 + $0x374] sm:$0xf0]  ;;  %v2703_v50 = vor.u32 %v3620_v45, %v2702_v43  ;;  %v2558_v53 = vld [vmem:[#allocation2 + $0x148] sm:$0xf] }
  0x8e   :  { %1806 = vmatpush.bf16.msrb.mxu1 %v3035_v51  ;;  %1819 = vmatpush.bf16.msrb.mxu2 %v3163_v52  ;;  %v2430_v51 = vld [vmem:[#allocation2 + $0x48] sm:$0xf]  ;;  %v3552_v52 = vld [vmem:[#allocation2 + $0x54] sm:$0xf0]  ;;  %v2831_v54 = vor.u32 %v3652_v47, %v2830_v46 }
  0x8f   :  { %1832 = vmatpush.bf16.msrb.mxu3 %v3291_v55  ;;  %1794 = vmatmul.bf16.vlgmr.msrb.gmra.mxu0 %v3960_v41  ;;  %v3584_v55 = vld [vmem:[#allocation2 + $0x154] sm:$0xf0]  ;;  %v2431_v60 = vor.u32 %v3552_v52, %v2430_v51  ;;  %v2414_v63 = vld [vmem:[#allocation2 + $0x28] sm:$0xf] }
  0x90   :  { %1838 = vmatpush.bf16.msra.mxu0 %v2511_v56  ;;  %v2686_v56 = vld [vmem:[#allocation2 + $0x248] sm:$0xf]  ;;  %v3648_v59 = vld [vmem:[#allocation2 + $0x354] sm:$0xf0]  ;;  %v2559_v61 = vor.u32 %v3584_v55, %v2558_v53 }
  0x91   :  { %1820 = vmatmul.bf16.vlgmr.msrb.gmra.mxu2 %v3958_v38  ;;  %1807 = vmatmul.bf16.vlgmr.msrb.gmra.mxu1 %v3964_v44  ;;  %v3548_v0 = vld [vmem:[#allocation2 + $0x34] sm:$0xf0]  ;;  %v2542_v1 = vld [vmem:[#allocation2 + $0x128] sm:$0xf] }
  0x92   :  { %1851 = vmatpush.bf16.msra.mxu1 %v2639_v57  ;;  %1864 = vmatpush.bf16.msra.mxu2 %v2767_v58  ;;  %v3616_v57 = vld [vmem:[#allocation2 + $0x254] sm:$0xf0]  ;;  %v2814_v58 = vld [vmem:[#allocation2 + $0x348] sm:$0xf]  ;;  %v2415_v8 = vor.u32 %v3548_v0, %v2414_v63 }
  0x93   :  { %1877 = vmatpush.bf16.msra.mxu3 %v2895_v62  ;;  %v2687_v62 = vor.u32 %v3616_v57, %v2686_v56  ;;  %v2815_v2 = vor.u32 %v3648_v59, %v2814_v58  ;;  %v3580_v3 = vld [vmem:[#allocation2 + $0x134] sm:$0xf0]  ;;  %v2398_v9 = vld [vmem:[#allocation2 + $0x8] sm:$0xf] }
  0x94   :  { %1833 = vmatmul.bf16.vlgmr.msrb.gmra.mxu3 %v3962_v42  ;;  %1839 = vmatpush.bf16.msra.mxu0 %v2495_v4  ;;  %v2670_v4 = vld [vmem:[#allocation2 + $0x228] sm:$0xf]  ;;  %v3644_v7 = vld [vmem:[#allocation2 + $0x334] sm:$0xf0]  ;;  %v2543_v11 = vor.u32 %v3580_v3, %v2542_v1 }
  0x95   :  { %v2526_v13 = vld [vmem:[#allocation2 + $0x108] sm:$0xf]  ;;  %v3576_v14 = vld [vmem:[#allocation2 + $0x114] sm:$0xf0] }
  0x96   :  { %1852 = vmatpush.bf16.msra.mxu1 %v2623_v5  ;;  %1865 = vmatpush.bf16.msra.mxu2 %v2751_v6  ;;  %v3612_v5 = vld [vmem:[#allocation2 + $0x234] sm:$0xf0]  ;;  %v2798_v6 = vld [vmem:[#allocation2 + $0x328] sm:$0xf]  ;;  %v2527_v31 = vor.u32 %v3576_v14, %v2526_v13 }
  0x97   :  { %1878 = vmatpush.bf16.msra.mxu3 %v2879_v10  ;;  %v3544_v10 = vld [vmem:[#allocation2 + $0x14] sm:$0xf0]  ;;  %v2671_v12 = vor.u32 %v3612_v5, %v2670_v4  ;;  %v2654_v15 = vld [vmem:[#allocation2 + $0x208] sm:$0xf] }
  0x98   :  { %1840 = vmatpush.bf16.msra.mxu0 %v2479_v16  ;;  %v2799_v16 = vor.u32 %v3644_v7, %v2798_v6  ;;  %v3640_v23 = vld [vmem:[#allocation2 + $0x314] sm:$0xf0]  ;;  %v3022_v24 = vld [vmem:[#allocation2 + $0x4e8] sm:$0xf]  ;;  %v2399_v27 = vor.u32 %v3544_v10, %v2398_v9 }
  0x99   :  { %v3700_v25 = vld [vmem:[#allocation2 + $0x4f4] sm:$0xf0]  ;;  %v3278_v29 = vld [vmem:[#allocation2 + $0x6e8] sm:$0xf] }
  0x9a   :  { %1853 = vmatpush.bf16.msra.mxu1 %v2607_v17  ;;  %1866 = vmatpush.bf16.msra.mxu2 %v2735_v21  ;;  %v3608_v17 = vld [vmem:[#allocation2 + $0x214] sm:$0xf0]  ;;  %v2782_v21 = vld [vmem:[#allocation2 + $0x308] sm:$0xf]  ;;  %v3023_v36 = vor.u32 %v3700_v25, %v3022_v24 }
  0x9b   :  { %1879 = vmatpush.bf16.msra.mxu3 %v2863_v26  ;;  %v3150_v26 = vld [vmem:[#allocation2 + $0x5e8] sm:$0xf]  ;;  %v3732_v28 = vld [vmem:[#allocation2 + $0x5f4] sm:$0xf0]  ;;  %v2783_v35 = vor.u32 %v3640_v23, %v2782_v21 }
  0x9c   :  { %1841 = vmatpush.bf16.msra.mxu0 %v2463_v32  ;;  %v3764_v30 = vld [vmem:[#allocation2 + $0x6f4] sm:$0xf0]  ;;  %v2655_v32 = vor.u32 %v3608_v17, %v2654_v15  ;;  %v3151_v37 = vor.u32 %v3732_v28, %v3150_v26  ;;  %v3006_v40 = vld [vmem:[#allocation2 + $0x4c8] sm:$0xf]  ;;  %v3985_v26 = vld [vmem:[%s4030_s2] sm:$0xf] }
  0x9d   :  { %v3696_v43 = vld [vmem:[#allocation2 + $0x4d4] sm:$0xf0]  ;;  %v3134_v45 = vld [vmem:[#allocation2 + $0x5c8] sm:$0xf] }
  0x9e   :  { %1854 = vmatpush.bf16.msra.mxu1 %v2591_v33  ;;  %1867 = vmatpush.bf16.msra.mxu2 %v2719_v34  ;;  %v3406_v33 = vld [vmem:[#allocation2 + $0x7e8] sm:$0xf]  ;;  %v3796_v34 = vld [vmem:[#allocation2 + $0x7f4] sm:$0xf0]  ;;  %v3007_v52 = vor.u32 %v3696_v43, %v3006_v40 }
  0x9f   :  { %1880 = vmatpush.bf16.msra.mxu3 %v2847_v39  ;;  %v3279_v39 = vor.u32 %v3764_v30, %v3278_v29  ;;  %v3407_v46 = vor.u32 %v3796_v34, %v3406_v33  ;;  %v3728_v47 = vld [vmem:[#allocation2 + $0x5d4] sm:$0xf0]  ;;  %v2990_v55 = vld [vmem:[#allocation2 + $0x4a8] sm:$0xf] }
  0xa0   :  { %1842 = vmatpush.bf16.msra.mxu0 %v2447_v48  ;;  %v3262_v48 = vld [vmem:[#allocation2 + $0x6c8] sm:$0xf]  ;;  %v3792_v51 = vld [vmem:[#allocation2 + $0x7d4] sm:$0xf0]  ;;  %v3135_v53 = vor.u32 %v3728_v47, %v3134_v45 }
  0xa1   :  { %v3692_v56 = vld [vmem:[#allocation2 + $0x4b4] sm:$0xf0]  ;;  %v3118_v57 = vld [vmem:[#allocation2 + $0x5a8] sm:$0xf] }
  0xa2   :  { %1855 = vmatpush.bf16.msra.mxu1 %v2575_v49  ;;  %1868 = vmatpush.bf16.msra.mxu2 %v2703_v50  ;;  %v3760_v49 = vld [vmem:[#allocation2 + $0x6d4] sm:$0xf0]  ;;  %v3390_v50 = vld [vmem:[#allocation2 + $0x7c8] sm:$0xf]  ;;  %v2991_v0 = vor.u32 %v3692_v56, %v2990_v55 }
  0xa3   :  { %1881 = vmatpush.bf16.msra.mxu3 %v2831_v54  ;;  %v3263_v54 = vor.u32 %v3760_v49, %v3262_v48  ;;  %v3391_v58 = vor.u32 %v3792_v51, %v3390_v50  ;;  %v3724_v59 = vld [vmem:[#allocation2 + $0x5b4] sm:$0xf0]  ;;  %v2974_v3 = vld [vmem:[#allocation2 + $0x488] sm:$0xf] }
  0xa4   :  { %1843 = vmatpush.bf16.msra.mxu0 %v2431_v60  ;;  %v3246_v60 = vld [vmem:[#allocation2 + $0x6a8] sm:$0xf]  ;;  %v3788_v63 = vld [vmem:[#allocation2 + $0x7b4] sm:$0xf0]  ;;  %v3119_v1 = vor.u32 %v3724_v59, %v3118_v57 }
  0xa5   :  { %v3688_v4 = vld [vmem:[#allocation2 + $0x494] sm:$0xf0]  ;;  %v3102_v5 = vld [vmem:[#allocation2 + $0x588] sm:$0xf] }
  0xa6   :  { %1856 = vmatpush.bf16.msra.mxu1 %v2559_v61  ;;  %1869 = vmatpush.bf16.msra.mxu2 %v2687_v62  ;;  %v3756_v61 = vld [vmem:[#allocation2 + $0x6b4] sm:$0xf0]  ;;  %v3374_v62 = vld [vmem:[#allocation2 + $0x7a8] sm:$0xf] }
  0xa7   :  { %1882 = vmatpush.bf16.msra.mxu3 %v2815_v2  ;;  %v3247_v2 = vor.u32 %v3756_v61, %v3246_v60  ;;  %v3375_v6 = vor.u32 %v3788_v63, %v3374_v62  ;;  %v3720_v7 = vld [vmem:[#allocation2 + $0x594] sm:$0xf0]  ;;  %v3358_v10 = vld [vmem:[#allocation2 + $0x788] sm:$0xf] }
  0xa8   :  { %1844 = vmatpush.bf16.msra.mxu0 %v2415_v8  ;;  %v3230_v8 = vld [vmem:[#allocation2 + $0x688] sm:$0xf]  ;;  %v3752_v9 = vld [vmem:[#allocation2 + $0x694] sm:$0xf0]  ;;  %v3103_v14 = vor.u32 %v3720_v7, %v3102_v5 }
  0xa9   :  { %v2958_v13 = vld [vmem:[#allocation2 + $0x468] sm:$0xf]  ;;  %v3231_v15 = vor.u32 %v3752_v9, %v3230_v8  ;;  %v3716_v21 = vld [vmem:[#allocation2 + $0x574] sm:$0xf0] }
  0xaa   :  { %1857 = vmatpush.bf16.msra.mxu1 %v2543_v11  ;;  %1870 = vmatpush.bf16.msra.mxu2 %v2671_v12  ;;  %v3784_v11 = vld [vmem:[#allocation2 + $0x794] sm:$0xf0]  ;;  %v2975_v12 = vor.u32 %v3688_v4, %v2974_v3  ;;  %v3086_v17 = vld [vmem:[#allocation2 + $0x568] sm:$0xf] }
  0xab   :  { %1883 = vmatpush.bf16.msra.mxu3 %v2799_v16  ;;  %v3684_v16 = vld [vmem:[#allocation2 + $0x474] sm:$0xf0]  ;;  %v3359_v23 = vor.u32 %v3784_v11, %v3358_v10  ;;  %v3214_v24 = vld [vmem:[#allocation2 + $0x668] sm:$0xf] }
  0xac   :  { %1845 = vmatpush.bf16.msra.mxu0 %v2399_v27  ;;  %v3748_v25 = vld [vmem:[#allocation2 + $0x674] sm:$0xf0]  ;;  %v3342_v27 = vld [vmem:[#allocation2 + $0x768] sm:$0xf]  ;;  %v2959_v29 = vor.u32 %v3684_v16, %v2958_v13  ;;  %v3570_v13 = vld [vmem:[#allocation2 + $0xec] sm:$0xf] }
  0xad   :  { %v3780_v28 = vld [vmem:[#allocation2 + $0x774] sm:$0xf0]  ;;  %v2942_v30 = vld [vmem:[#allocation2 + $0x448] sm:$0xf] }
  0xae   :  { %1858 = vmatpush.bf16.msra.mxu1 %v2527_v31  ;;  %1871 = vmatpush.bf16.msra.mxu2 %v2655_v32  ;;  %v3087_v31 = vor.u32 %v3716_v21, %v3086_v17  ;;  %v3215_v32 = vor.u32 %v3748_v25, %v3214_v24  ;;  %v3680_v33 = vld [vmem:[#allocation2 + $0x454] sm:$0xf0]  ;;  %v3070_v34 = vld [vmem:[#allocation2 + $0x548] sm:$0xf]  ;;  %v2640_v17 = vld [vmem:[#allocation2 + $0x1f8] sm:$0xf0] }
  0xaf   :  { %1884 = vmatpush.bf16.msra.mxu3 %v2783_v35  ;;  %1846 = vmatmul.bf16.vlgmr.msra.gmra.mxu0 %v3942_v19  ;;  %v314_v35 = vperm.slane %v3985_v26, 0  ;;  %v3744_v40 = vld [vmem:[#allocation2 + $0x654] sm:$0xf0]  ;;  %v3326_v43 = vld [vmem:[#allocation2 + $0x748] sm:$0xf] }
  0xb0   :  { %1890 = vmatpush.bf16.msrb.mxu0 %v3023_v36  ;;  %v3343_v36 = vor.u32 %v3780_v28, %v3342_v27  ;;  %v3776_v45 = vld [vmem:[#allocation2 + $0x754] sm:$0xf0]  ;;  %v2926_v50 = vld [vmem:[#allocation2 + $0x428] sm:$0xf]  ;;  %v3634_v21 = vld [vmem:[#allocation2 + $0x2ec] sm:$0xf] }
  0xb1   :  { %1872 = vmatmul.bf16.vlgmr.msra.gmra.mxu2 %v3940_v18  ;;  %1859 = vmatmul.bf16.vlgmr.msra.gmra.mxu1 %v3946_v22  ;;  %v3676_v51 = vld [vmem:[#allocation2 + $0x434] sm:$0xf0]  ;;  %v3327_v55 = vor.u32 %v3776_v45, %v3326_v43  ;;  %v3182_v57 = vld [vmem:[#allocation2 + $0x628] sm:$0xf]  ;;  %v2624_v43 = vld [vmem:[#allocation2 + $0x1d8] sm:$0xf0] }
  0xb2   :  { %1903 = vmatpush.bf16.msrb.mxu1 %v3151_v37  ;;  %1916 = vmatpush.bf16.msrb.mxu2 %v3279_v39  ;;  %v3712_v37 = vld [vmem:[#allocation2 + $0x554] sm:$0xf0]  ;;  %v3198_v39 = vld [vmem:[#allocation2 + $0x648] sm:$0xf]  ;;  %v2927_v62 = vor.u32 %v3676_v51, %v2926_v50  ;;  %v3630_v45 = vld [vmem:[#allocation2 + $0x2cc] sm:$0xf] }
  0xb3   :  { %1929 = vmatpush.bf16.msrb.mxu3 %v3407_v46  ;;  %v2943_v46 = vor.u32 %v3680_v33, %v2942_v30  ;;  %v3071_v48 = vor.u32 %v3712_v37, %v3070_v34  ;;  %v3199_v49 = vor.u32 %v3744_v40, %v3198_v39  ;;  %v3708_v56 = vld [vmem:[#allocation2 + $0x534] sm:$0xf0]  ;;  %v3310_v59 = vld [vmem:[#allocation2 + $0x728] sm:$0xf]  ;;  %v2896_v30 = vld [vmem:[#allocation2 + $0x3f8] sm:$0xf0] }
  0xb4   :  { %1885 = vmatmul.bf16.vlgmr.msra.gmra.mxu3 %v3944_v20  ;;  %1891 = vmatpush.bf16.msrb.mxu0 %v3007_v52  ;;  %v3054_v52 = vld [vmem:[#allocation2 + $0x528] sm:$0xf]  ;;  %v3772_v60 = vld [vmem:[#allocation2 + $0x734] sm:$0xf0]  ;;  %v2496_v37 = vld [vmem:[#allocation2 + $0xd8] sm:$0xf0] }
  0xb5   :  { %v2910_v63 = vld [vmem:[#allocation2 + $0x408] sm:$0xf]  ;;  %v3704_v4 = vld [vmem:[#allocation2 + $0x514] sm:$0xf0]  ;;  %v3311_v7 = vor.u32 %v3772_v60, %v3310_v59  ;;  %v3598_v39 = vld [vmem:[#allocation2 + $0x1cc] sm:$0xf] }
  0xb6   :  { %1904 = vmatpush.bf16.msrb.mxu1 %v3135_v53  ;;  %1917 = vmatpush.bf16.msrb.mxu2 %v3263_v54  ;;  %v3038_v3 = vld [vmem:[#allocation2 + $0x508] sm:$0xf]  ;;  %v3736_v8 = vld [vmem:[#allocation2 + $0x614] sm:$0xf0]  ;;  %v3626_v59 = vld [vmem:[#allocation2 + $0x2ac] sm:$0xf] }
  0xb7   :  { %1930 = vmatpush.bf16.msrb.mxu3 %v3391_v58  ;;  %v3740_v58 = vld [vmem:[#allocation2 + $0x634] sm:$0xf0]  ;;  %v3166_v5 = vld [vmem:[#allocation2 + $0x608] sm:$0xf]  ;;  %v3039_v27 = vor.u32 %v3704_v4, %v3038_v3  ;;  %v2736_v60 = vld [vmem:[#allocation2 + $0x2b8] sm:$0xf0] }
  0xb8   :  { %1892 = vmatpush.bf16.msrb.mxu0 %v2991_v0  ;;  %v3672_v0 = vld [vmem:[#allocation2 + $0x414] sm:$0xf0]  ;;  %v3294_v9 = vld [vmem:[#allocation2 + $0x708] sm:$0xf]  ;;  %v3167_v28 = vor.u32 %v3736_v8, %v3166_v5  ;;  %v2464_v3 = vld [vmem:[#allocation2 + $0x98] sm:$0xf0] }
  0xb9   :  { %v3768_v10 = vld [vmem:[#allocation2 + $0x714] sm:$0xf0]  ;;  %v2911_v16 = vor.u32 %v3672_v0, %v2910_v63  ;;  %v3590_v4 = vld [vmem:[#allocation2 + $0x18c] sm:$0xf]  ;;  %v2720_v8 = vld [vmem:[#allocation2 + $0x298] sm:$0xf0] }
  0xba   :  { %1905 = vmatpush.bf16.msrb.mxu1 %v3119_v1  ;;  %1918 = vmatpush.bf16.msrb.mxu2 %v3247_v2  ;;  %v1639_v47 = vpop.f32.mrf.mxu0  ;;  %v1652_v54 = vpop.f32.mrf.mxu1  ;;  %v3055_v1 = vor.u32 %v3708_v56, %v3054_v52  ;;  %v3183_v2 = vor.u32 %v3740_v58, %v3182_v57  ;;  %v2627_v52 = vor.u32 %v3598_v39, %v2624_v43  ;;  %v3594_v56 = vld [vmem:[#allocation2 + $0x1ac] sm:$0xf]  ;;  %v2608_v58 = vld [vmem:[#allocation2 + $0x1b8] sm:$0xf0] }
  0xbb   :  { %1931 = vmatpush.bf16.msrb.mxu3 %v3375_v6  ;;  %v1640_v53 = vadd.f32 %v1639_v47, %v314_v35  ;;  %v1665_v6 = vpop.f32.mrf.mxu2  ;;  %v3662_v47 = vld [vmem:[#allocation2 + $0x3cc] sm:$0xf]  ;;  %v2611_v0 = vor.u32 %v3594_v56, %v2608_v58  ;;  %v2560_v43 = vld [vmem:[#allocation2 + $0x158] sm:$0xf0] }
  0xbc   :  { %1893 = vmatpush.bf16.msrb.mxu0 %v2975_v12  ;;  %v1678_v12 = vpop.f32.mrf.mxu3  ;;  %v3582_v39 = vld [vmem:[#allocation2 + $0x14c] sm:$0xf] }
  0xbd   :  { %v1653_v61 = vadd.f32 %v1652_v54, %v1640_v53  ;;  %v3562_v54 = vld [vmem:[#allocation2 + $0xac] sm:$0xf] }
  0xbe   :  { %1906 = vmatpush.bf16.msrb.mxu1 %v3103_v14  ;;  %1919 = vmatpush.bf16.msrb.mxu2 %v3231_v15  ;;  %v2512_v14 = vld [vmem:[#allocation2 + $0xf8] sm:$0xf0]  ;;  %v3602_v15 = vld [vmem:[#allocation2 + $0x1ec] sm:$0xf] }
  0xbf   :  { %1932 = vmatpush.bf16.msrb.mxu3 %v3359_v23  ;;  %v1666_v11 = vadd.f32 %v1665_v6, %v1653_v61  ;;  %v2768_v23 = vld [vmem:[#allocation2 + $0x2f8] sm:$0xf0]  ;;  %v2515_v33 = vor.u32 %v3570_v13, %v2512_v14  ;;  %v2643_v34 = vor.u32 %v3602_v15, %v2640_v17  ;;  %v3658_v61 = vld [vmem:[#allocation2 + $0x3ac] sm:$0xf] }
  0xc0   :  { %1894 = vmatpush.bf16.msrb.mxu0 %v2959_v29  ;;  %v3666_v29 = vld [vmem:[#allocation2 + $0x3ec] sm:$0xf]  ;;  %v2771_v35 = vor.u32 %v3634_v21, %v2768_v23  ;;  %v2592_v6 = vld [vmem:[#allocation2 + $0x198] sm:$0xf0] }
  0xc1   :  { %v3988_v24 = vadd.f32 %v1678_v12, %v1666_v11  ;;  %v2899_v40 = vor.u32 %v3666_v29, %v2896_v30  ;;  %v2595_v13 = vor.u32 %v3590_v4, %v2592_v6  ;;  %v3554_v15 = vld [vmem:[#allocation2 + $0x6c] sm:$0xf]  ;;  %v2704_v29 = vld [vmem:[#allocation2 + $0x278] sm:$0xf0] }
  0xc2   :  { %1907 = vmatpush.bf16.msrb.mxu1 %v3087_v31  ;;  %1920 = vmatpush.bf16.msrb.mxu2 %v3215_v32  ;;  %v1641_v25 = vpop.f32.mrf.mxu0  ;;  %v1654_v31 = vpop.f32.mrf.mxu1  ;;  %v3295_v32 = vor.u32 %v3768_v10, %v3294_v9  ;;  %v3654_v9 = vld [vmem:[#allocation2 + $0x38c] sm:$0xf]  ;;  %v2848_v10 = vld [vmem:[#allocation2 + $0x398] sm:$0xf0] }
  0xc3   :  { %1933 = vmatpush.bf16.msrb.mxu3 %v3343_v36  ;;  %v3566_v36 = vld [vmem:[#allocation2 + $0xcc] sm:$0xf]  ;;  %v2851_v25 = vor.u32 %v3654_v9, %v2848_v10  ;;  %v2832_v31 = vld [vmem:[#allocation2 + $0x378] sm:$0xf0] }
  0xc4   :  { %1895 = vmatpush.bf16.msrb.mxu0 %v2943_v46  ;;  %v2752_v46 = vld [vmem:[#allocation2 + $0x2d8] sm:$0xf0]  ;;  %v2499_v50 = vor.u32 %v3566_v36, %v2496_v37  ;;  %v1680_v51 = vpop.f32.mrf.mxu3  ;;  %v3586_v17 = vld [vmem:[#allocation2 + $0x16c] sm:$0xf] }
  0xc5   :  { %v2755_v53 = vor.u32 %v3630_v45, %v2752_v46  ;;  %v3650_v30 = vld [vmem:[#allocation2 + $0x36c] sm:$0xf]  ;;  %v2432_v37 = vld [vmem:[#allocation2 + $0x58] sm:$0xf0] }
  0xc6   :  { %1908 = vmatpush.bf16.msrb.mxu1 %v3071_v48  ;;  %1921 = vmatpush.bf16.msrb.mxu2 %v3199_v49  ;;  %v2880_v48 = vld [vmem:[#allocation2 + $0x3d8] sm:$0xf0]  ;;  %v1667_v49 = vpop.f32.mrf.mxu2  ;;  %v3550_v36 = vld [vmem:[#allocation2 + $0x4c] sm:$0xf] }
  0xc7   :  { %1934 = vmatpush.bf16.msrb.mxu3 %v3327_v55  ;;  %v2480_v55 = vld [vmem:[#allocation2 + $0xb8] sm:$0xf0]  ;;  %v2883_v57 = vor.u32 %v3662_v47, %v2880_v48  ;;  %v3614_v45 = vld [vmem:[#allocation2 + $0x24c] sm:$0xf]  ;;  %v2435_v51 = vor.u32 %v3550_v36, %v2432_v37 }
  0xc8   :  { %1896 = vmatpush.bf16.msrb.mxu0 %v2927_v62  ;;  %v2864_v62 = vld [vmem:[#allocation2 + $0x3b8] sm:$0xf0]  ;;  %v2483_v63 = vor.u32 %v3562_v54, %v2480_v55  ;;  %v3646_v49 = vld [vmem:[#allocation2 + $0x34c] sm:$0xf]  ;;  %v2563_v54 = vor.u32 %v3582_v39, %v2560_v43 }
  0xc9   :  { %v2867_v5 = vor.u32 %v3658_v61, %v2864_v62  ;;  %v2688_v46 = vld [vmem:[#allocation2 + $0x258] sm:$0xf0]  ;;  %v3546_v56 = vld [vmem:[#allocation2 + $0x2c] sm:$0xf] }
  0xca   :  { %1909 = vmatpush.bf16.msrb.mxu1 %v3055_v1  ;;  %1922 = vmatpush.bf16.msrb.mxu2 %v3183_v2  ;;  %v2739_v1 = vor.u32 %v3626_v59, %v2736_v60  ;;  %v3558_v2 = vld [vmem:[#allocation2 + $0x8c] sm:$0xf]  ;;  %v2691_v55 = vor.u32 %v3614_v45, %v2688_v46  ;;  %v2544_v61 = vld [vmem:[#allocation2 + $0x138] sm:$0xf0] }
  0xcb   :  { %1935 = vmatpush.bf16.msrb.mxu3 %v3311_v7  ;;  %v3622_v7 = vld [vmem:[#allocation2 + $0x28c] sm:$0xf]  ;;  %v2467_v11 = vor.u32 %v3558_v2, %v2464_v3  ;;  %v2400_v4 = vld [vmem:[#allocation2 + $0x18] sm:$0xf0] }
  0xcc   :  { %1897 = vmatpush.bf16.msrb.mxu0 %v2911_v16  ;;  %v2723_v14 = vor.u32 %v3622_v7, %v2720_v8  ;;  %v2448_v16 = vld [vmem:[#allocation2 + $0x78] sm:$0xf0]  ;;  %v3578_v58 = vld [vmem:[#allocation2 + $0x12c] sm:$0xf] }
  0xcd   :  { %v3610_v62 = vld [vmem:[#allocation2 + $0x22c] sm:$0xf]  ;;  %v2528_v8 = vld [vmem:[#allocation2 + $0x118] sm:$0xf0] }
  0xce   :  { %1910 = vmatpush.bf16.msrb.mxu1 %v3039_v27  ;;  %1923 = vmatpush.bf16.msrb.mxu2 %v3167_v28  ;;  %v1691_v12 = vpop.f32.mrf.mxu0  ;;  %v2576_v27 = vld [vmem:[#allocation2 + $0x178] sm:$0xf0]  ;;  %v3618_v28 = vld [vmem:[#allocation2 + $0x26c] sm:$0xf] }
  0xcf   :  { %1936 = vmatpush.bf16.msrb.mxu3 %v3295_v32  ;;  %1898 = vmatmul.bf16.vlgmr.msrb.gmra.mxu0 %v3960_v41  ;;  %v1692_v21 = vadd.f32 %v1691_v12, %v3988_v24  ;;  %v2835_v24 = vor.u32 %v3650_v30, %v2832_v31  ;;  %v3542_v3 = vld [vmem:[#allocation2 + $0xc] sm:$0xf]  ;;  %v2656_v12 = vld [vmem:[#allocation2 + $0x218] sm:$0xf0] }
  0xd0   :  { %1942 = vmatpush.bf16.msra.mxu0 %v2515_v33  ;;  %v1704_v23 = vpop.f32.mrf.mxu1  ;;  %v2451_v33 = vor.u32 %v3554_v15, %v2448_v16  ;;  %v3574_v7 = vld [vmem:[#allocation2 + $0x10c] sm:$0xf]  ;;  %v3008_v39 = vld [vmem:[#allocation2 + $0x4d8] sm:$0xf0] }
  0xd1   :  { %1924 = vmatmul.bf16.vlgmr.msrb.gmra.mxu2 %v3958_v38  ;;  %1911 = vmatmul.bf16.vlgmr.msrb.gmra.mxu1 %v3964_v44  ;;  %v1705_v32 = vadd.f32 %v1704_v23, %v1692_v21  ;;  %v3606_v9 = vld [vmem:[#allocation2 + $0x20c] sm:$0xf]  ;;  %v2403_v23 = vor.u32 %v3542_v3, %v2400_v4  ;;  %v3136_v43 = vld [vmem:[#allocation2 + $0x5d8] sm:$0xf0] }
  0xd2   :  { %1955 = vmatpush.bf16.msra.mxu1 %v2643_v34  ;;  %1968 = vmatpush.bf16.msra.mxu2 %v2771_v35  ;;  %v2579_v34 = vor.u32 %v3586_v17, %v2576_v27  ;;  %v2707_v35 = vor.u32 %v3618_v28, %v2704_v29  ;;  %v3698_v16 = vld [vmem:[#allocation2 + $0x4ec] sm:$0xf]  ;;  %v3024_v17 = vld [vmem:[#allocation2 + $0x4f8] sm:$0xf0]  ;;  %v2531_v29 = vor.u32 %v3574_v7, %v2528_v8 }
  0xd3   :  { %1981 = vmatpush.bf16.msra.mxu3 %v2899_v40  ;;  %v3730_v21 = vld [vmem:[#allocation2 + $0x5ec] sm:$0xf]  ;;  %v3280_v28 = vld [vmem:[#allocation2 + $0x6f8] sm:$0xf0]  ;;  %v2659_v30 = vor.u32 %v3606_v9, %v2656_v12 }
  0xd4   :  { %1937 = vmatmul.bf16.vlgmr.msrb.gmra.mxu3 %v3962_v42  ;;  %1943 = vmatpush.bf16.msra.mxu0 %v2499_v50  ;;  %v1717_v40 = vpop.f32.mrf.mxu2  ;;  %v2816_v50 = vld [vmem:[#allocation2 + $0x358] sm:$0xf0]  ;;  %v3762_v27 = vld [vmem:[#allocation2 + $0x6ec] sm:$0xf] }
  0xd5   :  { %v1718_v47 = vadd.f32 %v1717_v40, %v1705_v32  ;;  %v2819_v60 = vor.u32 %v3646_v49, %v2816_v50  ;;  %v3794_v31 = vld [vmem:[#allocation2 + $0x7ec] sm:$0xf]  ;;  %v3408_v32 = vld [vmem:[#allocation2 + $0x7f8] sm:$0xf0]  ;;  %v3283_v36 = vor.u32 %v3762_v27, %v3280_v28 }
  0xd6   :  { %1956 = vmatpush.bf16.msra.mxu1 %v2627_v52  ;;  %1969 = vmatpush.bf16.msra.mxu2 %v2755_v53  ;;  %v1693_v53 = vpop.f32.mrf.mxu0  ;;  %v3694_v37 = vld [vmem:[#allocation2 + $0x4cc] sm:$0xf]  ;;  %v3264_v46 = vld [vmem:[#allocation2 + $0x6d8] sm:$0xf0] }
  0xd7   :  { %1982 = vmatpush.bf16.msra.mxu3 %v2883_v57  ;;  %v1730_v48 = vpop.f32.mrf.mxu3  ;;  %v2416_v57 = vld [vmem:[#allocation2 + $0x38] sm:$0xf0]  ;;  %v3726_v40 = vld [vmem:[#allocation2 + $0x5cc] sm:$0xf]  ;;  %v3011_v49 = vor.u32 %v3694_v37, %v3008_v39 }
  0xd8   :  { %1944 = vmatpush.bf16.msra.mxu0 %v2483_v63  ;;  %v3995_v52 = vadd.f32 %v1730_v48, %v1718_v47  ;;  %v1706_v59 = vpop.f32.mrf.mxu1  ;;  %v2672_v63 = vld [vmem:[#allocation2 + $0x238] sm:$0xf0]  ;;  %v2419_v2 = vor.u32 %v3546_v56, %v2416_v57  ;;  %v3758_v45 = vld [vmem:[#allocation2 + $0x6cc] sm:$0xf]  ;;  %v3139_v50 = vor.u32 %v3726_v40, %v3136_v43 }
  0xd9   :  { %v2675_v6 = vor.u32 %v3610_v62, %v2672_v63  ;;  %v3790_v47 = vld [vmem:[#allocation2 + $0x7cc] sm:$0xf]  ;;  %v3392_v48 = vld [vmem:[#allocation2 + $0x7d8] sm:$0xf0] }
  0xda   :  { %1957 = vmatpush.bf16.msra.mxu1 %v2611_v0  ;;  %1970 = vmatpush.bf16.msra.mxu2 %v2739_v1  ;;  %v3642_v0 = vld [vmem:[#allocation2 + $0x32c] sm:$0xf]  ;;  %v2800_v1 = vld [vmem:[#allocation2 + $0x338] sm:$0xf0]  ;;  %v3395_v56 = vor.u32 %v3790_v47, %v3392_v48 }
  0xdb   :  { %1983 = vmatpush.bf16.msra.mxu3 %v2867_v5  ;;  %v2547_v5 = vor.u32 %v3578_v58, %v2544_v61  ;;  %v3690_v53 = vld [vmem:[#allocation2 + $0x4ac] sm:$0xf]  ;;  %v3120_v57 = vld [vmem:[#allocation2 + $0x5b8] sm:$0xf0] }
  0xdc   :  { %1945 = vmatpush.bf16.msra.mxu0 %v2467_v11  ;;  %v1719_v10 = vpop.f32.mrf.mxu2  ;;  %v2803_v11 = vor.u32 %v3642_v0, %v2800_v1  ;;  %v3754_v58 = vld [vmem:[#allocation2 + $0x6ac] sm:$0xf]  ;;  %v3248_v59 = vld [vmem:[#allocation2 + $0x6b8] sm:$0xf0] }
  0xdd   :  { %v3376_v61 = vld [vmem:[#allocation2 + $0x7b8] sm:$0xf0]  ;;  %v3251_v0 = vor.u32 %v3754_v58, %v3248_v59  ;;  %v3686_v1 = vld [vmem:[#allocation2 + $0x48c] sm:$0xf] }
  0xde   :  { %1958 = vmatpush.bf16.msra.mxu1 %v2595_v13  ;;  %1971 = vmatpush.bf16.msra.mxu2 %v2723_v14  ;;  %v3638_v13 = vld [vmem:[#allocation2 + $0x30c] sm:$0xf]  ;;  %v2784_v14 = vld [vmem:[#allocation2 + $0x318] sm:$0xf0] }
  0xdf   :  { %1984 = vmatpush.bf16.msra.mxu3 %v2851_v25  ;;  %v1732_v15 = vpop.f32.mrf.mxu3  ;;  %v3152_v25 = vld [vmem:[#allocation2 + $0x5f8] sm:$0xf0]  ;;  %v3782_v7 = vld [vmem:[#allocation2 + $0x78c] sm:$0xf] }
  0xe0   :  { %1946 = vmatpush.bf16.msra.mxu0 %v2451_v33  ;;  %v2787_v33 = vor.u32 %v3638_v13, %v2784_v14  ;;  %v3104_v4 = vld [vmem:[#allocation2 + $0x598] sm:$0xf0]  ;;  %v3682_v10 = vld [vmem:[#allocation2 + $0x46c] sm:$0xf] }
  0xe1   :  { %v3714_v12 = vld [vmem:[#allocation2 + $0x56c] sm:$0xf]  ;;  %v3088_v15 = vld [vmem:[#allocation2 + $0x578] sm:$0xf0] }
  0xe2   :  { %1959 = vmatpush.bf16.msra.mxu1 %v2579_v34  ;;  %1972 = vmatpush.bf16.msra.mxu2 %v2707_v35  ;;  %v3027_v34 = vor.u32 %v3698_v16, %v3024_v17  ;;  %v3155_v35 = vor.u32 %v3730_v21, %v3152_v25  ;;  %v3746_v16 = vld [vmem:[#allocation2 + $0x66c] sm:$0xf]  ;;  %v3216_v17 = vld [vmem:[#allocation2 + $0x678] sm:$0xf0]  ;;  %v3091_v27 = vor.u32 %v3714_v12, %v3088_v15 }
  0xe3   :  { %1985 = vmatpush.bf16.msra.mxu3 %v2835_v24  ;;  %v3411_v24 = vor.u32 %v3794_v31, %v3408_v32  ;;  %v3778_v21 = vld [vmem:[#allocation2 + $0x76c] sm:$0xf]  ;;  %v3219_v28 = vor.u32 %v3746_v16, %v3216_v17  ;;  %v3328_v40 = vld [vmem:[#allocation2 + $0x758] sm:$0xf0]  ;;  %v3811_v17 = vld [vmem:[#allocation4 + $0x70] sm:$0xff] }
  0xe4   :  { %1947 = vmatpush.bf16.msra.mxu0 %v2435_v51  ;;  %v3267_v51 = vor.u32 %v3758_v45, %v3264_v46  ;;  %v3710_v31 = vld [vmem:[#allocation2 + $0x54c] sm:$0xf]  ;;  %v2928_v48 = vld [vmem:[#allocation2 + $0x438] sm:$0xf0] }
  0xe5   :  { %v3774_v39 = vld [vmem:[#allocation2 + $0x74c] sm:$0xf]  ;;  %v3812_v12 = vld [vmem:[#allocation4 + $0x78] sm:$0xff] }
  0xe6   :  { %1960 = vmatpush.bf16.msra.mxu1 %v2563_v54  ;;  %1973 = vmatpush.bf16.msra.mxu2 %v2691_v55  ;;  %v2992_v54 = vld [vmem:[#allocation2 + $0x4b8] sm:$0xf0]  ;;  %v3722_v55 = vld [vmem:[#allocation2 + $0x5ac] sm:$0xf] }
  0xe7   :  { %1986 = vmatpush.bf16.msra.mxu3 %v2819_v60  ;;  %v3786_v60 = vld [vmem:[#allocation2 + $0x7ac] sm:$0xf]  ;;  %v2995_v62 = vor.u32 %v3690_v53, %v2992_v54  ;;  %v3123_v63 = vor.u32 %v3722_v55, %v3120_v57  ;;  %v3056_v53 = vld [vmem:[#allocation2 + $0x538] sm:$0xf0] }
  0xe8   :  { %1948 = vmatpush.bf16.msra.mxu0 %v2419_v2  ;;  %v2976_v2 = vld [vmem:[#allocation2 + $0x498] sm:$0xf0]  ;;  %v3379_v3 = vor.u32 %v3786_v60, %v3376_v61  ;;  %v3674_v47 = vld [vmem:[#allocation2 + $0x42c] sm:$0xf] }
  0xe9   :  { %v3738_v54 = vld [vmem:[#allocation2 + $0x62c] sm:$0xf]  ;;  %v3184_v55 = vld [vmem:[#allocation2 + $0x638] sm:$0xf0]  ;;  %v2931_v58 = vor.u32 %v3674_v47, %v2928_v48 }
  0xea   :  { %1961 = vmatpush.bf16.msra.mxu1 %v2547_v5  ;;  %1974 = vmatpush.bf16.msra.mxu2 %v2675_v6  ;;  %v3750_v5 = vld [vmem:[#allocation2 + $0x68c] sm:$0xf]  ;;  %v3232_v6 = vld [vmem:[#allocation2 + $0x698] sm:$0xf0]  ;;  %v3187_v61 = vor.u32 %v3738_v54, %v3184_v55  ;;  %v3815_v54 = vld [vmem:[#allocation4 + $0x90] sm:$0xff] }
  0xeb   :  { %1987 = vmatpush.bf16.msra.mxu3 %v2803_v11  ;;  %v3235_v9 = vor.u32 %v3750_v5, %v3232_v6  ;;  %v2960_v11 = vld [vmem:[#allocation2 + $0x478] sm:$0xf0]  ;;  %v3670_v59 = vld [vmem:[#allocation2 + $0x40c] sm:$0xf] }
  0xec   :  { %1949 = vmatpush.bf16.msra.mxu0 %v2403_v23  ;;  %v4001_v8 = vpop.f32.mrf.mxu0  ;;  %v3344_v23 = vld [vmem:[#allocation2 + $0x778] sm:$0xf0]  ;;  %v2963_v25 = vor.u32 %v3682_v10, %v2960_v11  ;;  %v3766_v6 = vld [vmem:[#allocation2 + $0x70c] sm:$0xf] }
  0xed   :  { %v3312_v57 = vld [vmem:[#allocation2 + $0x738] sm:$0xf0] }
  0xee   :  { %1962 = vmatpush.bf16.msra.mxu1 %v2531_v29  ;;  %1975 = vmatpush.bf16.msra.mxu2 %v2659_v30  ;;  %v4003_v13 = vpop.f32.mrf.mxu1  ;;  %v3678_v29 = vld [vmem:[#allocation2 + $0x44c] sm:$0xf]  ;;  %v2944_v30 = vld [vmem:[#allocation2 + $0x458] sm:$0xf0] }
  0xef   :  { %1988 = vmatpush.bf16.msra.mxu3 %v2787_v33  ;;  %1950 = vmatmul.bf16.vlgmr.msra.gmra.mxu0 %v3942_v19  ;;  %v3360_v19 = vld [vmem:[#allocation2 + $0x798] sm:$0xf0]  ;;  %v3347_v33 = vor.u32 %v3778_v21, %v3344_v23  ;;  %v3802_v21 = vld [vmem:[#allocation4 + $0x28] sm:$0xff] }
  0xf0   :  { %1994 = vmatpush.bf16.msrb.mxu0 %v3027_v34  ;;  %v3363_v14 = vor.u32 %v3782_v7, %v3360_v19  ;;  %v3072_v34 = vld [vmem:[#allocation2 + $0x558] sm:$0xf0]  ;;  %v3810_v23 = vld [vmem:[#allocation4 + $0x68] sm:$0xff] }
  0xf1   :  { %1976 = vmatmul.bf16.vlgmr.msra.gmra.mxu2 %v3940_v18  ;;  %1963 = vmatmul.bf16.vlgmr.msra.gmra.mxu1 %v3946_v22  ;;  %v3718_v18 = vld [vmem:[#allocation2 + $0x58c] sm:$0xf]  ;;  %v3075_v45 = vor.u32 %v3710_v31, %v3072_v34  ;;  %v3296_v7 = vld [vmem:[#allocation2 + $0x718] sm:$0xf0]  ;;  %v3799_v34 = vld [vmem:[#allocation4 + $0x10] sm:$0xff] }
  0xf2   :  { %2007 = vmatpush.bf16.msrb.mxu1 %v3155_v35  ;;  %2020 = vmatpush.bf16.msrb.mxu2 %v3283_v36  ;;  %v3107_v22 = vor.u32 %v3718_v18, %v3104_v4  ;;  %v3742_v35 = vld [vmem:[#allocation2 + $0x64c] sm:$0xf]  ;;  %v3200_v36 = vld [vmem:[#allocation2 + $0x658] sm:$0xf0]  ;;  %v315_v4 = vperm.slane %v3985_v26, 1 }
  0xf3   :  { %2033 = vmatpush.bf16.msrb.mxu3 %v3411_v24  ;;  %v2947_v24 = vor.u32 %v3678_v29, %v2944_v30  ;;  %v3203_v46 = vor.u32 %v3742_v35, %v3200_v36  ;;  %v3734_v18 = vld [vmem:[#allocation2 + $0x60c] sm:$0xf]  ;;  %v3804_v10 = vld [vmem:[#allocation4 + $0x38] sm:$0xff] }
  0xf4   :  { %1989 = vmatmul.bf16.vlgmr.msra.gmra.mxu3 %v3944_v20  ;;  %1995 = vmatpush.bf16.msrb.mxu0 %v3011_v49  ;;  %v2979_v20 = vor.u32 %v3686_v1, %v2976_v2  ;;  %v4005_v32 = vpop.f32.mrf.mxu2  ;;  %v1745_v43 = vpop.f32.mrf.mxu0  ;;  %v3706_v49 = vld [vmem:[#allocation2 + $0x52c] sm:$0xf]  ;;  %v1744_v11 = vadd.f32 %v4001_v8, %v315_v4  ;;  %v3820_v16 = vld [vmem:[#allocation4 + $0xb8] sm:$0xff] }
  0xf5   :  { %v3059_v60 = vor.u32 %v3706_v49, %v3056_v53  ;;  %v3818_v29 = vld [vmem:[#allocation4 + $0xa8] sm:$0xff]  ;;  %v3808_v30 = vld [vmem:[#allocation4 + $0x58] sm:$0xff]  ;;  %v3797_v49 = vld [vmem:[#allocation4] sm:$0xff]  ;;  %v2046_v53 = vpack.c.bf16 %v3995_v52, %v3995_v52 }
  0xf6   :  { %2008 = vmatpush.bf16.msrb.mxu1 %v3139_v50  ;;  %2021 = vmatpush.bf16.msrb.mxu2 %v3267_v51  ;;  %v1758_v50 = vpop.f32.mrf.mxu1  ;;  %v3331_v51 = vor.u32 %v3774_v39, %v3328_v40  ;;  %v1757_v15 = vadd.f32 %v4003_v13, %v1744_v11  ;;  %v3816_v40 = vld [vmem:[#allocation4 + $0x98] sm:$0xff]  ;;  %v3798_v43 = vld [vmem:[#allocation4 + $0x8] sm:$0xff] }
  0xf7   :  { %2034 = vmatpush.bf16.msrb.mxu3 %v3395_v56  ;;  %v4007_v37 = vpop.f32.mrf.mxu3  ;;  %v3770_v56 = vld [vmem:[#allocation2 + $0x72c] sm:$0xf]  ;;  %v3805_v50 = vld [vmem:[#allocation4 + $0x40] sm:$0xff] }
  0xf8   :  { %1996 = vmatpush.bf16.msrb.mxu0 %v2995_v62  ;;  %v2912_v62 = vld [vmem:[#allocation2 + $0x418] sm:$0xf0]  ;;  %v3315_v2 = vor.u32 %v3770_v56, %v3312_v57  ;;  %v1770_v8 = vadd.f32 %v4005_v32, %v1757_v15  ;;  %v3814_v57 = vld [vmem:[#allocation4 + $0x88] sm:$0xff] }
  0xf9   :  { %v2915_v19 = vor.u32 %v3670_v59, %v2912_v62 }
  0xfa   :  { %2009 = vmatpush.bf16.msrb.mxu1 %v3123_v63  ;;  %2022 = vmatpush.bf16.msrb.mxu2 %v3251_v0  ;;  %v3702_v63 = vld [vmem:[#allocation2 + $0x50c] sm:$0xf]  ;;  %v3040_v0 = vld [vmem:[#allocation2 + $0x518] sm:$0xf0]  ;;  %v1783_v13 = vadd.f32 %v4007_v37, %v1770_v8  ;;  %v3807_v37 = vld [vmem:[#allocation4 + $0x50] sm:$0xff] }
  0xfb   :  { %2035 = vmatpush.bf16.msrb.mxu3 %v3379_v3  ;;  %v3168_v3 = vld [vmem:[#allocation2 + $0x618] sm:$0xf0] }
  0xfc   :  { %1997 = vmatpush.bf16.msrb.mxu0 %v2979_v20  ;;  %v1771_v1 = vpop.f32.mrf.mxu2  ;;  %v3043_v20 = vor.u32 %v3702_v63, %v3040_v0  ;;  %v316_v63 = vperm.slane %v3985_v26, 2 }
  0xfe   :  { %2010 = vmatpush.bf16.msrb.mxu1 %v3107_v22  ;;  %2023 = vmatpush.bf16.msrb.mxu2 %v3235_v9  ;;  %v3171_v22 = vor.u32 %v3734_v18, %v3168_v3  ;;  %v3299_v9 = vor.u32 %v3766_v6, %v3296_v7 }
  0xff   :  { %2036 = vmatpush.bf16.msrb.mxu3 %v3363_v14  ;;  %v1784_v5 = vpop.f32.mrf.mxu3  ;;  %v3803_v14 = vld [vmem:[#allocation4 + $0x30] sm:$0xff] }
 0x100   :  { %1998 = vmatpush.bf16.msrb.mxu0 %v2963_v25  ;;  %v3819_v25 = vld [vmem:[#allocation4 + $0xb0] sm:$0xff] }
 0x102   :  { %2011 = vmatpush.bf16.msrb.mxu1 %v3091_v27  ;;  %2024 = vmatpush.bf16.msrb.mxu2 %v3219_v28  ;;  %v3801_v27 = vld [vmem:[#allocation4 + $0x20] sm:$0xff] }
 0x103   :  { %2037 = vmatpush.bf16.msrb.mxu3 %v3347_v33  ;;  %v3809_v28 = vld [vmem:[#allocation4 + $0x60] sm:$0xff] }
 0x104   :  { %1999 = vmatpush.bf16.msrb.mxu0 %v2947_v24  ;;  %v3817_v33 = vld [vmem:[#allocation4 + $0xa0] sm:$0xff] }
 0x106   :  { %2012 = vmatpush.bf16.msrb.mxu1 %v3075_v45  ;;  %2025 = vmatpush.bf16.msrb.mxu2 %v3203_v46  ;;  %v3806_v45 = vld [vmem:[#allocation4 + $0x48] sm:$0xff] }
 0x107   :  { %2038 = vmatpush.bf16.msrb.mxu3 %v3331_v51 }
 0x108   :  { %2000 = vmatpush.bf16.msrb.mxu0 %v2931_v58 }
 0x10a   :  { %2013 = vmatpush.bf16.msrb.mxu1 %v3059_v60  ;;  %2026 = vmatpush.bf16.msrb.mxu2 %v3187_v61  ;;  %v3813_v61 = vld [vmem:[#allocation4 + $0x80] sm:$0xff] }
 0x10b   :  { %2039 = vmatpush.bf16.msrb.mxu3 %v3315_v2 }
 0x10c   :  { %2001 = vmatpush.bf16.msrb.mxu0 %v2915_v19  ;;  %v3828_v19 = vld [vmem:[#allocation4 + $0xf8] sm:$0xff] }
 0x10e   :  { %2014 = vmatpush.bf16.msrb.mxu1 %v3043_v20  ;;  %2027 = vmatpush.bf16.msrb.mxu2 %v3171_v22 }
 0x10f   :  { %2040 = vmatpush.bf16.msrb.mxu3 %v3299_v9  ;;  %2002 = vmatmul.bf16.vlgmr.msrb.gmra.mxu0 %v3960_v41  ;;  %v1795_v41 = vpop.f32.mrf.mxu0 }
 0x110   :  { %2310 = vmatpush.bf16.msra.mxu0 %v3804_v10  ;;  %v3827_v10 = vld [vmem:[#allocation4 + $0xf0] sm:$0xff] }
 0x111   :  { %2015 = vmatmul.bf16.vlgmr.msrb.gmra.mxu1 %v3964_v44  ;;  %2028 = vmatmul.bf16.vlgmr.msrb.gmra.mxu2 %v3958_v38  ;;  %v1808_v44 = vpop.f32.mrf.mxu1  ;;  %v3800_v38 = vld [vmem:[#allocation4 + $0x18] sm:$0xff] }
 0x112   :  { %2323 = vmatpush.bf16.msra.mxu1 %v3812_v12  ;;  %2041 = vmatmul.bf16.vlgmr.msrb.gmra.mxu3 %v3962_v42  ;;  %v1796_v42 = vadd.f32 %v1795_v41, %v1783_v13  ;;  %v3822_v41 = vld [vmem:[#allocation4 + $0xc8] sm:$0xff] }
 0x113   :  { %2336 = vmatpush.bf16.msra.mxu2 %v3820_v16  ;;  %2349 = vmatpush.bf16.msra.mxu3 %v3828_v19  ;;  %v3826_v16 = vld [vmem:[#allocation4 + $0xe8] sm:$0xff] }
 0x114   :  { %2311 = vmatpush.bf16.msra.mxu0 %v3803_v14  ;;  %v1821_v31 = vpop.f32.mrf.mxu2  ;;  %v1809_v35 = vadd.f32 %v1808_v44, %v1796_v42 }
 0x116   :  { %2324 = vmatpush.bf16.msra.mxu1 %v3811_v17  ;;  %v1822_v24 = vadd.f32 %v1821_v31, %v1809_v35 }
 0x117   :  { %2337 = vmatpush.bf16.msra.mxu2 %v3819_v25  ;;  %v1834_v32 = vpop.f32.mrf.mxu3  ;;  %v1797_v36 = vpop.f32.mrf.mxu0  ;;  %2350 = vmatpush.bf16.msra.mxu3 %v3827_v10  ;;  %v3823_v25 = vld [vmem:[#allocation4 + $0xd0] sm:$0xff] }
 0x118   :  { %2312 = vmatpush.bf16.msra.mxu0 %v3802_v21  ;;  %v1835_v48 = vadd.f32 %v1834_v32, %v1822_v24  ;;  %v3825_v21 = vld [vmem:[#allocation4 + $0xe0] sm:$0xff] }
 0x119   :  { %v1810_v39 = vpop.f32.mrf.mxu1 }
 0x11a   :  { %2325 = vmatpush.bf16.msra.mxu1 %v3810_v23  ;;  %v2047_v51 = vpack.c.bf16 %v1835_v48, %v1835_v48  ;;  %v3824_v23 = vld [vmem:[#allocation4 + $0xd8] sm:$0xff] }
 0x11b   :  { %2338 = vmatpush.bf16.msra.mxu2 %v3818_v29  ;;  %2351 = vmatpush.bf16.msra.mxu3 %v3826_v16 }
 0x11c   :  { %2313 = vmatpush.bf16.msra.mxu0 %v3801_v27  ;;  %v1823_v46 = vpop.f32.mrf.mxu2 }
 0x11e   :  { %2326 = vmatpush.bf16.msra.mxu1 %v3809_v28 }
 0x11f   :  { %2339 = vmatpush.bf16.msra.mxu2 %v3817_v33  ;;  %v1836_v47 = vpop.f32.mrf.mxu3  ;;  %2352 = vmatpush.bf16.msra.mxu3 %v3825_v21 }
 0x120   :  { %2314 = vmatpush.bf16.msra.mxu0 %v3800_v38  ;;  %v3821_v38 = vld [vmem:[#allocation4 + $0xc0] sm:$0xff] }
 0x122   :  { %2327 = vmatpush.bf16.msra.mxu1 %v3808_v30  ;;  %v317_v30 = vperm.slane %v3985_v26, 3 }
 0x123   :  { %2340 = vmatpush.bf16.msra.mxu2 %v3816_v40  ;;  %2353 = vmatpush.bf16.msra.mxu3 %v3824_v23 }
 0x124   :  { %2315 = vmatpush.bf16.msra.mxu0 %v3799_v34 }
 0x126   :  { %2328 = vmatpush.bf16.msra.mxu1 %v3807_v37 }
 0x127   :  { %2341 = vmatpush.bf16.msra.mxu2 %v3815_v54  ;;  %2354 = vmatpush.bf16.msra.mxu3 %v3823_v25 }
 0x128   :  { %2316 = vmatpush.bf16.msra.mxu0 %v3798_v43 }
 0x12a   :  { %2329 = vmatpush.bf16.msra.mxu1 %v3806_v45 }
 0x12b   :  { %2342 = vmatpush.bf16.msra.mxu2 %v3814_v57  ;;  %2355 = vmatpush.bf16.msra.mxu3 %v3822_v41 }
 0x12c   :  { %2317 = vmatpush.bf16.msra.mxu0 %v3797_v49  ;;  %v1847_v55 = vpop.f32.mrf.mxu0 }
 0x12d   :  { %v1848_v52 = vadd.f32 %v1847_v55, %v316_v63 }
 0x12e   :  { %2330 = vmatpush.bf16.msra.mxu1 %v3805_v50  ;;  %v1860_v56 = vpop.f32.mrf.mxu1 }
 0x12f   :  { %2318 = vmatmul.bf16.vlgmr.msra.gmra.mxu0 %v2046_v53  ;;  %2343 = vmatpush.bf16.msra.mxu2 %v3813_v61  ;;  %v1861_v2 = vadd.f32 %v1860_v56, %v1848_v52  ;;  %v3835_v53 = vld [vmem:[%s4032_s4] ss:$0 sm:$0xff] }
 0x130   :  { %2356 = vmatpush.bf16.msra.mxu3 %v3821_v38 }
 0x131   :  { %2331 = vmatmul.bf16.vlgmr.msra.gmra.mxu1 %v2047_v51 }
 0x134   :  { %v1873_v58 = vpop.f32.mrf.mxu2  ;;  %v1849_v60 = vpop.f32.mrf.mxu0 }
 0x135   :  { %v1874_v18 = vadd.f32 %v1873_v58, %v1861_v2 }
 0x136   :  { %v1862_v62 = vpop.f32.mrf.mxu1 }
 0x137   :  { %v1886_v59 = vpop.f32.mrf.mxu3 }
 0x138   :  { %v1887_v3 = vadd.f32 %v1886_v59, %v1874_v18 }
 0x13c   :  { %v1875_v0 = vpop.f32.mrf.mxu2 }
 0x13f   :  { %v1888_v1 = vpop.f32.mrf.mxu3 }
 0x14c   :  { %v1899_v4 = vpop.f32.mrf.mxu0 }
 0x14d   :  { %v1900_v5 = vadd.f32 %v1899_v4, %v1887_v3 }
 0x14e   :  { %v1912_v6 = vpop.f32.mrf.mxu1 }
 0x14f   :  { %v1913_v7 = vadd.f32 %v1912_v6, %v1900_v5 }
 0x154   :  { %v1925_v20 = vpop.f32.mrf.mxu2  ;;  %v1901_v12 = vpop.f32.mrf.mxu0 }
 0x155   :  { %v1926_v22 = vadd.f32 %v1925_v20, %v1913_v7 }
 0x156   :  { %v1914_v14 = vpop.f32.mrf.mxu1 }
 0x157   :  { %v1938_v9 = vpop.f32.mrf.mxu3 }
 0x158   :  { %v1939_v11 = vadd.f32 %v1938_v9, %v1926_v22 }
 0x15a   :  { %v2048_v15 = vpack.c.bf16 %v1939_v11, %v1939_v11 }
 0x15c   :  { %2344 = vmatmul.bf16.vlgmr.msra.gmra.mxu2 %v2048_v15  ;;  %v1927_v17 = vpop.f32.mrf.mxu2 }
 0x15f   :  { %v1940_v8 = vpop.f32.mrf.mxu3 }
 0x16c   :  { %v1951_v13 = vpop.f32.mrf.mxu0 }
 0x16d   :  { %v1952_v33 = vadd.f32 %v1951_v13, %v317_v30 }
 0x16e   :  { %v1964_v27 = vpop.f32.mrf.mxu1 }
 0x16f   :  { %v1965_v34 = vadd.f32 %v1964_v27, %v1952_v33 }
 0x174   :  { %v1977_v28 = vpop.f32.mrf.mxu2  ;;  %v1953_v42 = vpop.f32.mrf.mxu0 }
 0x175   :  { %v1978_v35 = vadd.f32 %v1977_v28, %v1965_v34 }
 0x176   :  { %v1966_v29 = vpop.f32.mrf.mxu1 }
 0x177   :  { %v1990_v44 = vpop.f32.mrf.mxu3 }
 0x178   :  { %v1991_v36 = vadd.f32 %v1990_v44, %v1978_v35 }
 0x17c   :  { %v1979_v31 = vpop.f32.mrf.mxu2 }
 0x17f   :  { %v1992_v32 = vpop.f32.mrf.mxu3 }
 0x18c   :  { %v2003_v37 = vpop.f32.mrf.mxu0 }
 0x18d   :  { %v2004_v40 = vadd.f32 %v2003_v37, %v1991_v36 }
 0x18e   :  { %v2016_v39 = vpop.f32.mrf.mxu1 }
 0x18f   :  { %v2017_v24 = vadd.f32 %v2016_v39, %v2004_v40 }
 0x194   :  { %v2029_v43 = vpop.f32.mrf.mxu2  ;;  %v2005_v47 = vpop.f32.mrf.mxu0 }
 0x195   :  { %v2030_v45 = vadd.f32 %v2029_v43, %v2017_v24  ;;  %v2042_v46 = vpop.f32.mrf.mxu3 }
 0x196   :  { %v2018_v48 = vpop.f32.mrf.mxu1 }
 0x197   :  { %v2043_v49 = vadd.f32 %v2042_v46, %v2030_v45 }
 0x199   :  { %v2049_v50 = vpack.c.bf16 %v2043_v49, %v2043_v49 }
 0x19b   :  { %2357 = vmatmul.bf16.vlgmr.msra.gmra.mxu3 %v2049_v50 }
 0x19c   :  { %v2031_v51 = vpop.f32.mrf.mxu2 }
 0x19d   :  { %v2044_v26 = vpop.f32.mrf.mxu3 }
 0x1ac   :  { %v2319_v54 = vpop.f32.mrf.mxu0 }
 0x1ad   :  { %v2320_v55 = vadd.f32 %v3835_v53, %v2319_v54 }
 0x1ae   :  { %v2332_v56 = vpop.f32.mrf.mxu1 }
 0x1af   :  { %v2333_v57 = vadd.f32 %v2332_v56, %v2320_v55 }
 0x1b4   :  { %v2321_v58 = vpop.f32.mrf.mxu0 }
 0x1b6   :  { %v2334_v59 = vpop.f32.mrf.mxu1 }
 0x1df   :  { %v2345_v60 = vpop.f32.mrf.mxu2 }
 0x1e0   :  { %v2346_v62 = vadd.f32 %v2345_v60, %v2333_v57 }
 0x1e7   :  { %v2347_v61 = vpop.f32.mrf.mxu2 }
 0x21e   :  { %v2358_v63 = vpop.f32.mrf.mxu3 }
 0x21f   :  { %v2359_v0 = vadd.f32 %v2358_v63, %v2346_v62 }
 0x221   :  { %v3540_v1 = vmul.f32 -1.442695, %v2359_v0 }
 0x223   :  { %3836 = vpow2.f32 %v3540_v1 }
 0x226   :  { %v2360_v52 = vpop.f32.mrf.mxu3 }
 0x229   :  { %v3837_v2 = vpop.eup %3836 }
 0x22a   :  { %v2365_v18 = vadd.f32 1.0, %v3837_v2 }
 0x22c   :  { %3838 = vrcp.f32 %v2365_v18  ;;  %v2377_v6 = vand.u32 2147483648, %v2365_v18  ;;  %v2375_v19 = vand.u32 2147483647, %v2365_v18  ;;  %vm2371_vm1 = vweird.f32 %v2365_v18 }
 0x22e   :  { %v2378_v22 = vor.u32 1.1754944e-38, %v2377_v6  ;;  %vm2376_vm3 = vcmp.eq.f32.partialorder %v2375_v19, 8.507059e+37 }
 0x232   :  { %v3839_v3 = vpop.eup %3838 }
 0x233   :  { %v2367_v4 = vmul.f32 %v3839_v3, %v2365_v18  ;;  %vm2372_vm0 = vweird.f32 %v3839_v3 }
 0x234   :  { %vm2373_vm2 = vmor %vm2371_vm1, %vm2372_vm0 }
 0x235   :  { %v2368_v5 = vsub.f32 1.0, %v2367_v4 }
 0x237   :  { %v2369_v7 = vmul.f32 %v3839_v3, %v2368_v5 }
 0x239   :  { %v2370_v20 = vadd.f32 %v3839_v3, %v2369_v7 }
 0x23b   :  { %v2374_v9 = vsel %vm2373_vm2, %v3839_v3, %v2370_v20 }
 0x23c   :  { %v2379_v10 = vsel %vm2376_vm3, %v2378_v22, %v2374_v9 }
 0x23d   :  { %2381 = vst [vmem:[%s4033_s5] sm:$0xff] %v2379_v10 }
 0x23e   :  { %2386 = vsyncpa [#allocation3], 1 }
 0x23f   :  { %2387 = vsyncpa [#allocation5], 1 }

</bundles_post_ra>
